<compile_context>
chip_gen: v7x
topology: tpu7x:2x2x1
jax: 0.10.0
libtpu: 0.0.40
codegen_flags: <defaults>
</compile_context>

<pallas_src>
import functools
import math

import jax
import jax.numpy as jnp
from jax.experimental import pallas as pl
from jax.experimental.pallas import tpu as pltpu

# --------------------------- tiny-BERT configuration ------------------------
VOCAB = 128
HIDDEN = 32
N_HEADS = 2
HEAD_DIM = HIDDEN // N_HEADS
N_LAYERS = 2
INTERMEDIATE = 64
MAX_POS = 16
TYPE_VOCAB = 2
NUM_CLASSES = 3
LN_EPS = 1e-12
ATTN_SCALE = 1.0 / math.sqrt(HEAD_DIM)

# Column layout inside the bf16 weight slab (L+1, HIDDEN, SLAB_W).
QKV_OFF = 0                               # [  0, 96): W_q | W_k | W_v (head-major cols)
AO_OFF = 3 * HIDDEN                       # [ 96,128): attention output projection
FFN_IN_OFF = 4 * HIDDEN                   # [128,192): FFN intermediate
FFN_OUT_OFF = FFN_IN_OFF + INTERMEDIATE   # [192,256): FFN output, stored transposed (H, I)
SLAB_W = FFN_OUT_OFF + INTERMEDIATE       # 256
# Head slot (index N_LAYERS): [0,128) lane-padded classifier, [128,160) pooler.
CLS_OFF = 0
POOL_OFF = 128

# Row layout inside the f32 bias/LN vector slab (VEC_ROWS, 128).
VEC_EMB_LN_G, VEC_EMB_LN_B = 0, 1
VEC_LAYER_BASE = 2
(QKV_B, AO_B, ATTN_LN_G, ATTN_LN_B, FFN_IN_B, FFN_OUT_B, OUT_LN_G, OUT_LN_B) = range(8)
VEC_PER_LAYER = 8
VEC_POOL_B = VEC_LAYER_BASE + N_LAYERS * VEC_PER_LAYER
VEC_CLS_B = VEC_POOL_B + 1
VEC_ROWS = -(-(VEC_CLS_B + 1) // 8) * 8


# ------------------------------ fused Pallas kernel --------------------------
def _layer_norm(x, g, b):
    mean = jnp.mean(x, axis=-1, keepdims=True)
    var = jnp.mean(jnp.square(x - mean), axis=-1, keepdims=True)
    return (x - mean) * jax.lax.rsqrt(var + LN_EPS) * g + b


def _fused_bert_kernel(emb_ref, mask_ref, w_ref, vec_ref, out_ref, *, batch, seq):
    """Whole BERT forward on a (batch*seq, HIDDEN) activation slab resident in VMEM."""
    bs = batch * seq
    vecs = vec_ref[...]                                   # (VEC_ROWS, 128) f32, loaded once

    # Embedding LayerNorm (no residual, no zeros slab).
    x = _layer_norm(emb_ref[...],
                    vecs[VEC_EMB_LN_G:VEC_EMB_LN_G + 1, :HIDDEN],
                    vecs[VEC_EMB_LN_B:VEC_EMB_LN_B + 1, :HIDDEN])          # (BS, H) f32

    for l in range(N_LAYERS):
        wl = w_ref[l]                                     # (H, SLAB_W) bf16, one load per layer
        vb = VEC_LAYER_BASE + l * VEC_PER_LAYER

        # ---- fused QKV projection: 1 MXU push for all heads & q/k/v ----
        qkv = jnp.dot(x.astype(jnp.bfloat16), wl[:, QKV_OFF:QKV_OFF + 3 * HIDDEN],
                      preferred_element_type=jnp.float32)
        qkv = qkv + vecs[vb + QKV_B:vb + QKV_B + 1, :3 * HIDDEN]           # (BS, 3H)

        # ---- stack heads along sublanes -> (NH*BS, Dh); single scores + single p@v matmul ----
        q = jnp.concatenate(
            [qkv[:, h * HEAD_DIM:(h + 1) * HEAD_DIM] for h in range(N_HEADS)], axis=0)
        k = jnp.concatenate(
            [qkv[:, HIDDEN + h * HEAD_DIM:HIDDEN + (h + 1) * HEAD_DIM] for h in range(N_HEADS)], axis=0)
        v = jnp.concatenate(
            [qkv[:, 2 * HIDDEN + h * HEAD_DIM:2 * HIDDEN + (h + 1) * HEAD_DIM] for h in range(N_HEADS)], axis=0)

        s = jax.lax.dot_general(q.astype(jnp.bfloat16), k.astype(jnp.bfloat16),
                                (((1,), (1,)), ((), ())),
                                preferred_element_type=jnp.float32)        # (NH*BS, NH*BS)
        s = s * ATTN_SCALE + mask_ref[...]            # block-diag mask kills cross-(b,h) blocks
        s = s - jnp.max(s, axis=-1, keepdims=True)
        p = jnp.exp(s)
        p = p * pl.reciprocal(jnp.sum(p, axis=-1, keepdims=True), approx=True)
        ctx = jnp.dot(p.astype(jnp.bfloat16), v.astype(jnp.bfloat16),
                      preferred_element_type=jnp.float32)                  # (NH*BS, Dh)

        # ---- un-stack heads back to lanes; single fused output projection ----
        ctx = jnp.concatenate([ctx[h * bs:(h + 1) * bs, :] for h in range(N_HEADS)], axis=1)
        attn_out = jnp.dot(ctx.astype(jnp.bfloat16), wl[:, AO_OFF:AO_OFF + HIDDEN],
                           preferred_element_type=jnp.float32)
        attn_out = attn_out + vecs[vb + AO_B:vb + AO_B + 1, :HIDDEN]
        x = _layer_norm(attn_out + x,
                        vecs[vb + ATTN_LN_G:vb + ATTN_LN_G + 1, :HIDDEN],
                        vecs[vb + ATTN_LN_B:vb + ATTN_LN_B + 1, :HIDDEN])

        # ---- feed-forward ----
        inter = jnp.dot(x.astype(jnp.bfloat16), wl[:, FFN_IN_OFF:FFN_IN_OFF + INTERMEDIATE],
                        preferred_element_type=jnp.float32)
        inter = inter + vecs[vb + FFN_IN_B:vb + FFN_IN_B + 1, :INTERMEDIATE]
        # TODO(synk): HF BERT default is exact erf-GELU; tanh approximation used here.
        inter = jax.nn.gelu(inter, approximate=True)
        ffn_out = jax.lax.dot_general(inter.astype(jnp.bfloat16),
                                      wl[:, FFN_OUT_OFF:FFN_OUT_OFF + INTERMEDIATE],
                                      (((1,), (1,)), ((), ())),
                                      preferred_element_type=jnp.float32)
        ffn_out = ffn_out + vecs[vb + FFN_OUT_B:vb + FFN_OUT_B + 1, :HIDDEN]
        x = _layer_norm(ffn_out + x,
                        vecs[vb + OUT_LN_G:vb + OUT_LN_G + 1, :HIDDEN],
                        vecs[vb + OUT_LN_B:vb + OUT_LN_B + 1, :HIDDEN])

    # ---- pooler + classifier on CLS rows only (sublane-aligned row slices) ----
    wh = w_ref[N_LAYERS]                                  # head slot: [cls_pad | pool_w]
    cls_tok = jnp.concatenate([x[b * seq:b * seq + 1, :] for b in range(batch)], axis=0)  # (B, H)
    pooled = jnp.tanh(
        jnp.dot(cls_tok.astype(jnp.bfloat16), wh[:, POOL_OFF:POOL_OFF + HIDDEN],
                preferred_element_type=jnp.float32) + vecs[VEC_POOL_B:VEC_POOL_B + 1, :HIDDEN])
    # Lane-dense (B, 128) logits store; wrapper slices the NUM_CLASSES columns.
    out_ref[...] = (jnp.dot(pooled.astype(jnp.bfloat16), wh[:, CLS_OFF:CLS_OFF + 128],
                            preferred_element_type=jnp.float32)
                    + vecs[VEC_CLS_B:VEC_CLS_B + 1, :])


def _fused_encoder(emb, add_mask, w_all, vecs, batch, seq):
    kernel = functools.partial(_fused_bert_kernel, batch=batch, seq=seq)
    vmem = pl.BlockSpec(memory_space=pltpu.MemorySpace.VMEM)
    # TODO(synk): at real BERT sizes add a row-tile grid marked "parallel" and stream
    # per-layer weights via double-buffered BlockSpecs (v7x has only 64 MiB VMEM);
    # not needed for this 16x32 activation slab.
    return pl.pallas_call(
        kernel,
        out_shape=jax.ShapeDtypeStruct((batch, 128), jnp.float32),
        in_specs=[vmem] * 4,
        out_specs=vmem,
    )(emb, add_mask, w_all, vecs)


# ------------------------------ parameter packing ----------------------------
def pack_params(p):
    """One-time packing (call OUTSIDE the jitted forward).
       w_all (L+1, H, 256) bf16: per-layer [Wqkv | Wao | Wi | Wo^T]; last slot [cls_pad | pool_w].
       vecs  (VEC_ROWS, 128) f32: every bias / LayerNorm vector as one lane-padded row."""
    slabs = []
    for lyr in p["layers"]:
        slabs.append(jnp.concatenate(
            [lyr["q_w"], lyr["k_w"], lyr["v_w"], lyr["ao_w"], lyr["i_w"], lyr["o_w"].T], axis=1))
    cls_pad = jnp.zeros((HIDDEN, 128), jnp.float32).at[:, :NUM_CLASSES].set(p["cls_w"])
    head = jnp.concatenate(
        [cls_pad, p["pool_w"], jnp.zeros((HIDDEN, SLAB_W - POOL_OFF - HIDDEN), jnp.float32)], axis=1)
    slabs.append(head)
    w_all = jnp.stack(slabs, axis=0).astype(jnp.bfloat16)                  # (L+1, H, 256)

    def row(v):
        return jnp.zeros((128,), jnp.float32).at[:v.shape[0]].set(v)

    rows = [row(p["emb_ln_g"]), row(p["emb_ln_b"])]
    for lyr in p["layers"]:
        rows += [row(jnp.concatenate([lyr["q_b"], lyr["k_b"], lyr["v_b"]])),
                 row(lyr["ao_b"]), row(lyr["attn_ln_g"]), row(lyr["attn_ln_b"]),
                 row(lyr["i_b"]), row(lyr["o_b"]), row(lyr["out_ln_g"]), row(lyr["out_ln_b"])]
    rows += [row(p["pool_b"]), row(p["cls_b"])]
    rows += [jnp.zeros((128,), jnp.float32)] * (VEC_ROWS - len(rows))
    vecs = jnp.stack(rows, axis=0)                                         # (VEC_ROWS, 128)
    return {"w_all": w_all, "vecs": vecs}


# ------------------------------ parameters ----------------------------------
def init_params(key):
    def nrm(k, shape):
        return 0.02 * jax.random.normal(k, shape, jnp.float32)

    keys = iter(jax.random.split(key, 8 + N_LAYERS * 16))
    p = {
        "word_emb": nrm(next(keys), (VOCAB, HIDDEN)),
        "pos_emb": nrm(next(keys), (MAX_POS, HIDDEN)),
        "type_emb": nrm(next(keys), (TYPE_VOCAB, HIDDEN)),
        "emb_ln_g": jnp.ones((HIDDEN,), jnp.float32),
        "emb_ln_b": jnp.zeros((HIDDEN,), jnp.float32),
        "pool_w": nrm(next(keys), (HIDDEN, HIDDEN)),
        "pool_b": jnp.zeros((HIDDEN,), jnp.float32),
        "cls_w": nrm(next(keys), (HIDDEN, NUM_CLASSES)),
        "cls_b": jnp.zeros((NUM_CLASSES,), jnp.float32),
        "layers": [],
    }
    for _ in range(N_LAYERS):
        lyr = {
            "q_w": nrm(next(keys), (HIDDEN, HIDDEN)), "q_b": jnp.zeros((HIDDEN,), jnp.float32),
            "k_w": nrm(next(keys), (HIDDEN, HIDDEN)), "k_b": jnp.zeros((HIDDEN,), jnp.float32),
            "v_w": nrm(next(keys), (HIDDEN, HIDDEN)), "v_b": jnp.zeros((HIDDEN,), jnp.float32),
            "ao_w": nrm(next(keys), (HIDDEN, HIDDEN)), "ao_b": jnp.zeros((HIDDEN,), jnp.float32),
            "attn_ln_g": jnp.ones((HIDDEN,), jnp.float32),
            "attn_ln_b": jnp.zeros((HIDDEN,), jnp.float32),
            "i_w": nrm(next(keys), (HIDDEN, INTERMEDIATE)), "i_b": jnp.zeros((INTERMEDIATE,), jnp.float32),
            "o_w": nrm(next(keys), (INTERMEDIATE, HIDDEN)), "o_b": jnp.zeros((HIDDEN,), jnp.float32),
            "out_ln_g": jnp.ones((HIDDEN,), jnp.float32),
            "out_ln_b": jnp.zeros((HIDDEN,), jnp.float32),
        }
        p["layers"].append(lyr)
    return p


# ------------------------------ forward pass ---------------------------------
def bert_forward(params, packed, input_ids, attention_mask, labels=None):
    B, S = input_ids.shape

    # Embedding gather (plain-JAX glue); LayerNorm happens inside the kernel.
    word = jnp.take(params["word_emb"], input_ids, axis=0)                 # (B, S, H)
    pos = params["pos_emb"][:S][None, :, :]                                # (1, S, H)
    typ = params["type_emb"][0][None, None, :]                             # token_type_ids = 0
    emb = (word + pos + typ).reshape(B * S, HIDDEN)

    # Block-diagonal additive mask for the (head,batch)-stacked attention layout:
    # row/col index = h*(B*S) + b*S + s; cross-(b,h) blocks and padded keys get -1e9.
    M = N_HEADS * B * S
    key_valid = jnp.tile(attention_mask.reshape(1, B * S).astype(jnp.float32), (1, N_HEADS))
    blk_r = (jnp.arange(M) // S)[:, None]
    blk_c = (jnp.arange(M) // S)[None, :]
    add_mask = jnp.where(blk_r == blk_c, (key_valid - 1.0) * 1e9, jnp.float32(-1e9))  # (M, M)

    logits_pad = _fused_encoder(emb, add_mask, packed["w_all"], packed["vecs"], B, S)  # (B, 128)
    logits = logits_pad[:, :NUM_CLASSES]

    loss = None
    if labels is not None:
        logp = jax.nn.log_softmax(logits, axis=-1)
        loss = -jnp.mean(jnp.take_along_axis(logp, labels[:, None], axis=1))
    return loss, logits


# ---------------------------------- main -------------------------------------
if __name__ == "__main__":
    key = jax.random.PRNGKey(0)
    pkey, ikey = jax.random.split(key)
    params = init_params(pkey)
    packed = pack_params(params)          # one-time packing, outside the jitted forward

    B, S = 2, 8
    input_ids = jax.random.randint(ikey, (B, S), 0, VOCAB, dtype=jnp.int32)
    attention_mask = jnp.array(
        [[1, 1, 1, 1, 1, 1, 1, 1],
         [1, 1, 1, 1, 1, 0, 0, 0]], dtype=jnp.int32)
    labels = jnp.array([0, 2], dtype=jnp.int32)

    loss, logits = jax.jit(bert_forward)(params, packed, input_ids, attention_mask, labels)
    jax.block_until_ready((loss, logits))
    assert logits.shape == (B, NUM_CLASSES)
    assert jnp.isfinite(loss) and bool(jnp.all(jnp.isfinite(logits)))
    print("KERNEL_OK")
</pallas_src>

<mosaic_0001>
module attributes {stable_mosaic.version = 11 : i64} {
  func.func @_fused_bert_kernel(%arg0: memref<16x32xf32, #tpu.memory_space<vmem>>, %arg1: memref<32x32xf32, #tpu.memory_space<vmem>>, %arg2: memref<3x32x256xbf16, #tpu.memory_space<vmem>>, %arg3: memref<24x128xf32, #tpu.memory_space<vmem>>, %arg4: memref<2x128xf32, #tpu.memory_space<vmem>>) attributes {dimension_semantics = [], scalar_prefetch = 0 : i64, scratch_operands = 0 : i64, tpu.core_type = #tpu.core_type<tc>} {
    %c0 = arith.constant 0 : index
    %c0_0 = arith.constant 0 : index
    %0 = vector.load %arg3[%c0, %c0_0] : memref<24x128xf32, #tpu.memory_space<vmem>>, vector<24x128xf32>
    %c0_1 = arith.constant 0 : index
    %c0_2 = arith.constant 0 : index
    %1 = vector.load %arg0[%c0_1, %c0_2] : memref<16x32xf32, #tpu.memory_space<vmem>>, vector<16x32xf32>
    %2 = vector.extract_strided_slice %0 {offsets = [0, 0], sizes = [1, 32], strides = [1, 1]} : vector<24x128xf32> to vector<1x32xf32>
    %3 = vector.extract_strided_slice %0 {offsets = [1, 0], sizes = [1, 32], strides = [1, 1]} : vector<24x128xf32> to vector<1x32xf32>
    %cst = arith.constant dense<0.000000e+00> : vector<16xf32>
    %4 = vector.multi_reduction <add>, %1, %cst [1] : vector<16x32xf32> to vector<16xf32>
    %5 = vector.shape_cast %4 : vector<16xf32> to vector<16x1xf32>
    %cst_3 = arith.constant 3.200000e+01 : f32
    %6 = vector.broadcast %cst_3 : f32 to vector<16x1xf32>
    %7 = arith.divf %5, %6 : vector<16x1xf32>
    %8 = vector.broadcast %7 : vector<16x1xf32> to vector<16x32xf32>
    %9 = arith.subf %1, %8 : vector<16x32xf32>
    %10 = arith.mulf %9, %9 : vector<16x32xf32>
    %cst_4 = arith.constant dense<0.000000e+00> : vector<16xf32>
    %11 = vector.multi_reduction <add>, %10, %cst_4 [1] : vector<16x32xf32> to vector<16xf32>
    %12 = vector.shape_cast %11 : vector<16xf32> to vector<16x1xf32>
    %cst_5 = arith.constant 3.200000e+01 : f32
    %13 = vector.broadcast %cst_5 : f32 to vector<16x1xf32>
    %14 = arith.divf %12, %13 : vector<16x1xf32>
    %15 = vector.broadcast %7 : vector<16x1xf32> to vector<16x32xf32>
    %16 = arith.subf %1, %15 : vector<16x32xf32>
    %cst_6 = arith.constant 9.99999996E-13 : f32
    %17 = vector.broadcast %cst_6 : f32 to vector<16x1xf32>
    %18 = arith.addf %14, %17 : vector<16x1xf32>
    %19 = math.rsqrt %18 : vector<16x1xf32>
    %20 = vector.broadcast %19 : vector<16x1xf32> to vector<16x32xf32>
    %21 = arith.mulf %16, %20 : vector<16x32xf32>
    %22 = vector.broadcast %2 : vector<1x32xf32> to vector<16x32xf32>
    %23 = arith.mulf %21, %22 : vector<16x32xf32>
    %24 = vector.broadcast %3 : vector<1x32xf32> to vector<16x32xf32>
    %25 = arith.addf %23, %24 : vector<16x32xf32>
    %c0_7 = arith.constant 0 : index
    %c0_8 = arith.constant 0 : index
    %c0_9 = arith.constant 0 : index
    %26 = vector.load %arg2[%c0_7, %c0_8, %c0_9] : memref<3x32x256xbf16, #tpu.memory_space<vmem>>, vector<1x32x256xbf16>
    %27 = vector.shape_cast %26 : vector<1x32x256xbf16> to vector<32x256xbf16>
    %28 = arith.truncf %25 : vector<16x32xf32> to vector<16x32xbf16>
    %29 = vector.extract_strided_slice %27 {offsets = [0, 0], sizes = [32, 96], strides = [1, 1]} : vector<32x256xbf16> to vector<32x96xbf16>
    %cst_10 = arith.constant dense<0.000000e+00> : vector<16x96xf32>
    %30 = tpu.matmul %28, %29, %cst_10 {dimension_numbers = #tpu.dot_dimension_numbers<[1], [0], [0], [1], [0, 0, 1, 1], [], []>} : vector<16x32xbf16>, vector<32x96xbf16>, vector<16x96xf32> -> vector<16x96xf32>
    %31 = vector.extract_strided_slice %0 {offsets = [2, 0], sizes = [1, 96], strides = [1, 1]} : vector<24x128xf32> to vector<1x96xf32>
    %32 = vector.broadcast %31 : vector<1x96xf32> to vector<16x96xf32>
    %33 = arith.addf %30, %32 : vector<16x96xf32>
    %34 = vector.extract_strided_slice %33 {offsets = [0, 0], sizes = [16, 16], strides = [1, 1]} : vector<16x96xf32> to vector<16x16xf32>
    %35 = vector.extract_strided_slice %33 {offsets = [0, 16], sizes = [16, 16], strides = [1, 1]} : vector<16x96xf32> to vector<16x16xf32>
    %36 = tpu.concatenate %34, %35 in 0 : vector<16x16xf32>, vector<16x16xf32> -> vector<32x16xf32>
    %37 = vector.extract_strided_slice %33 {offsets = [0, 32], sizes = [16, 16], strides = [1, 1]} : vector<16x96xf32> to vector<16x16xf32>
    %38 = vector.extract_strided_slice %33 {offsets = [0, 48], sizes = [16, 16], strides = [1, 1]} : vector<16x96xf32> to vector<16x16xf32>
    %39 = tpu.concatenate %37, %38 in 0 : vector<16x16xf32>, vector<16x16xf32> -> vector<32x16xf32>
    %40 = vector.extract_strided_slice %33 {offsets = [0, 64], sizes = [16, 16], strides = [1, 1]} : vector<16x96xf32> to vector<16x16xf32>
    %41 = vector.extract_strided_slice %33 {offsets = [0, 80], sizes = [16, 16], strides = [1, 1]} : vector<16x96xf32> to vector<16x16xf32>
    %42 = tpu.concatenate %40, %41 in 0 : vector<16x16xf32>, vector<16x16xf32> -> vector<32x16xf32>
    %43 = arith.truncf %36 : vector<32x16xf32> to vector<32x16xbf16>
    %44 = arith.truncf %39 : vector<32x16xf32> to vector<32x16xbf16>
    %cst_11 = arith.constant dense<0.000000e+00> : vector<32x32xf32>
    %45 = tpu.matmul %43, %44, %cst_11 {dimension_numbers = #tpu.dot_dimension_numbers<[1], [1], [0], [0], [0, 0, 1, 0], [], []>} : vector<32x16xbf16>, vector<32x16xbf16>, vector<32x32xf32> -> vector<32x32xf32>
    %cst_12 = arith.constant 2.500000e-01 : f32
    %46 = vector.broadcast %cst_12 : f32 to vector<32x32xf32>
    %47 = arith.mulf %45, %46 : vector<32x32xf32>
    %c0_13 = arith.constant 0 : index
    %c0_14 = arith.constant 0 : index
    %48 = vector.load %arg1[%c0_13, %c0_14] : memref<32x32xf32, #tpu.memory_space<vmem>>, vector<32x32xf32>
    %49 = arith.addf %47, %48 : vector<32x32xf32>
    %cst_15 = arith.constant dense<0xFF800000> : vector<32xf32>
    %50 = vector.multi_reduction <maximumf>, %49, %cst_15 [1] : vector<32x32xf32> to vector<32xf32>
    %51 = vector.shape_cast %50 : vector<32xf32> to vector<32x1xf32>
    %52 = vector.broadcast %51 : vector<32x1xf32> to vector<32x32xf32>
    %53 = arith.subf %49, %52 : vector<32x32xf32>
    %54 = math.exp %53 : vector<32x32xf32>
    %cst_16 = arith.constant dense<0.000000e+00> : vector<32xf32>
    %55 = vector.multi_reduction <add>, %54, %cst_16 [1] : vector<32x32xf32> to vector<32xf32>
    %56 = vector.shape_cast %55 : vector<32xf32> to vector<32x1xf32>
    %57 = tpu.reciprocal %56 {approx = true} : vector<32x1xf32> -> vector<32x1xf32>
    %58 = vector.broadcast %57 : vector<32x1xf32> to vector<32x32xf32>
    %59 = arith.mulf %54, %58 : vector<32x32xf32>
    %60 = arith.truncf %59 : vector<32x32xf32> to vector<32x32xbf16>
    %61 = arith.truncf %42 : vector<32x16xf32> to vector<32x16xbf16>
    %cst_17 = arith.constant dense<0.000000e+00> : vector<32x16xf32>
    %62 = tpu.matmul %60, %61, %cst_17 {dimension_numbers = #tpu.dot_dimension_numbers<[1], [0], [0], [1], [0, 0, 1, 1], [], []>} : vector<32x32xbf16>, vector<32x16xbf16>, vector<32x16xf32> -> vector<32x16xf32>
    %63 = vector.extract_strided_slice %62 {offsets = [0, 0], sizes = [16, 16], strides = [1, 1]} : vector<32x16xf32> to vector<16x16xf32>
    %64 = vector.extract_strided_slice %62 {offsets = [16, 0], sizes = [16, 16], strides = [1, 1]} : vector<32x16xf32> to vector<16x16xf32>
    %65 = tpu.concatenate %63, %64 in 1 : vector<16x16xf32>, vector<16x16xf32> -> vector<16x32xf32>
    %66 = arith.truncf %65 : vector<16x32xf32> to vector<16x32xbf16>
    %67 = vector.extract_strided_slice %27 {offsets = [0, 96], sizes = [32, 32], strides = [1, 1]} : vector<32x256xbf16> to vector<32x32xbf16>
    %cst_18 = arith.constant dense<0.000000e+00> : vector<16x32xf32>
    %68 = tpu.matmul %66, %67, %cst_18 {dimension_numbers = #tpu.dot_dimension_numbers<[1], [0], [0], [1], [0, 0, 1, 1], [], []>} : vector<16x32xbf16>, vector<32x32xbf16>, vector<16x32xf32> -> vector<16x32xf32>
    %69 = vector.extract_strided_slice %0 {offsets = [3, 0], sizes = [1, 32], strides = [1, 1]} : vector<24x128xf32> to vector<1x32xf32>
    %70 = vector.broadcast %69 : vector<1x32xf32> to vector<16x32xf32>
    %71 = arith.addf %68, %70 : vector<16x32xf32>
    %72 = arith.addf %71, %25 : vector<16x32xf32>
    %73 = vector.extract_strided_slice %0 {offsets = [4, 0], sizes = [1, 32], strides = [1, 1]} : vector<24x128xf32> to vector<1x32xf32>
    %74 = vector.extract_strided_slice %0 {offsets = [5, 0], sizes = [1, 32], strides = [1, 1]} : vector<24x128xf32> to vector<1x32xf32>
    %cst_19 = arith.constant dense<0.000000e+00> : vector<16xf32>
    %75 = vector.multi_reduction <add>, %72, %cst_19 [1] : vector<16x32xf32> to vector<16xf32>
    %76 = vector.shape_cast %75 : vector<16xf32> to vector<16x1xf32>
    %cst_20 = arith.constant 3.200000e+01 : f32
    %77 = vector.broadcast %cst_20 : f32 to vector<16x1xf32>
    %78 = arith.divf %76, %77 : vector<16x1xf32>
    %79 = vector.broadcast %78 : vector<16x1xf32> to vector<16x32xf32>
    %80 = arith.subf %72, %79 : vector<16x32xf32>
    %81 = arith.mulf %80, %80 : vector<16x32xf32>
    %cst_21 = arith.constant dense<0.000000e+00> : vector<16xf32>
    %82 = vector.multi_reduction <add>, %81, %cst_21 [1] : vector<16x32xf32> to vector<16xf32>
    %83 = vector.shape_cast %82 : vector<16xf32> to vector<16x1xf32>
    %cst_22 = arith.constant 3.200000e+01 : f32
    %84 = vector.broadcast %cst_22 : f32 to vector<16x1xf32>
    %85 = arith.divf %83, %84 : vector<16x1xf32>
    %86 = vector.broadcast %78 : vector<16x1xf32> to vector<16x32xf32>
    %87 = arith.subf %72, %86 : vector<16x32xf32>
    %cst_23 = arith.constant 9.99999996E-13 : f32
    %88 = vector.broadcast %cst_23 : f32 to vector<16x1xf32>
    %89 = arith.addf %85, %88 : vector<16x1xf32>
    %90 = math.rsqrt %89 : vector<16x1xf32>
    %91 = vector.broadcast %90 : vector<16x1xf32> to vector<16x32xf32>
    %92 = arith.mulf %87, %91 : vector<16x32xf32>
    %93 = vector.broadcast %73 : vector<1x32xf32> to vector<16x32xf32>
    %94 = arith.mulf %92, %93 : vector<16x32xf32>
    %95 = vector.broadcast %74 : vector<1x32xf32> to vector<16x32xf32>
    %96 = arith.addf %94, %95 : vector<16x32xf32>
    %97 = arith.truncf %96 : vector<16x32xf32> to vector<16x32xbf16>
    %98 = vector.extract_strided_slice %27 {offsets = [0, 128], sizes = [32, 64], strides = [1, 1]} : vector<32x256xbf16> to vector<32x64xbf16>
    %cst_24 = arith.constant dense<0.000000e+00> : vector<16x64xf32>
    %99 = tpu.matmul %97, %98, %cst_24 {dimension_numbers = #tpu.dot_dimension_numbers<[1], [0], [0], [1], [0, 0, 1, 1], [], []>} : vector<16x32xbf16>, vector<32x64xbf16>, vector<16x64xf32> -> vector<16x64xf32>
    %100 = vector.extract_strided_slice %0 {offsets = [6, 0], sizes = [1, 64], strides = [1, 1]} : vector<24x128xf32> to vector<1x64xf32>
    %101 = vector.broadcast %100 : vector<1x64xf32> to vector<16x64xf32>
    %102 = arith.addf %99, %101 : vector<16x64xf32>
    %103 = arith.mulf %102, %102 : vector<16x64xf32>
    %104 = arith.mulf %102, %103 : vector<16x64xf32>
    %cst_25 = arith.constant 4.471500e-02 : f32
    %105 = vector.broadcast %cst_25 : f32 to vector<16x64xf32>
    %106 = arith.mulf %105, %104 : vector<16x64xf32>
    %107 = arith.addf %102, %106 : vector<16x64xf32>
    %cst_26 = arith.constant 0.797884583 : f32
    %108 = vector.broadcast %cst_26 : f32 to vector<16x64xf32>
    %109 = arith.mulf %108, %107 : vector<16x64xf32>
    %110 = math.tanh %109 : vector<16x64xf32>
    %cst_27 = arith.constant 1.000000e+00 : f32
    %111 = vector.broadcast %cst_27 : f32 to vector<16x64xf32>
    %112 = arith.addf %111, %110 : vector<16x64xf32>
    %cst_28 = arith.constant 5.000000e-01 : f32
    %113 = vector.broadcast %cst_28 : f32 to vector<16x64xf32>
    %114 = arith.mulf %113, %112 : vector<16x64xf32>
    %115 = arith.mulf %102, %114 : vector<16x64xf32>
    %116 = arith.truncf %115 : vector<16x64xf32> to vector<16x64xbf16>
    %117 = vector.extract_strided_slice %27 {offsets = [0, 192], sizes = [32, 64], strides = [1, 1]} : vector<32x256xbf16> to vector<32x64xbf16>
    %cst_29 = arith.constant dense<0.000000e+00> : vector<16x32xf32>
    %118 = tpu.matmul %116, %117, %cst_29 {dimension_numbers = #tpu.dot_dimension_numbers<[1], [1], [0], [0], [0, 0, 1, 0], [], []>} : vector<16x64xbf16>, vector<32x64xbf16>, vector<16x32xf32> -> vector<16x32xf32>
    %119 = vector.extract_strided_slice %0 {offsets = [7, 0], sizes = [1, 32], strides = [1, 1]} : vector<24x128xf32> to vector<1x32xf32>
    %120 = vector.broadcast %119 : vector<1x32xf32> to vector<16x32xf32>
    %121 = arith.addf %118, %120 : vector<16x32xf32>
    %122 = arith.addf %121, %96 : vector<16x32xf32>
    %123 = vector.extract_strided_slice %0 {offsets = [8, 0], sizes = [1, 32], strides = [1, 1]} : vector<24x128xf32> to vector<1x32xf32>
    %124 = vector.extract_strided_slice %0 {offsets = [9, 0], sizes = [1, 32], strides = [1, 1]} : vector<24x128xf32> to vector<1x32xf32>
    %cst_30 = arith.constant dense<0.000000e+00> : vector<16xf32>
    %125 = vector.multi_reduction <add>, %122, %cst_30 [1] : vector<16x32xf32> to vector<16xf32>
    %126 = vector.shape_cast %125 : vector<16xf32> to vector<16x1xf32>
    %cst_31 = arith.constant 3.200000e+01 : f32
    %127 = vector.broadcast %cst_31 : f32 to vector<16x1xf32>
    %128 = arith.divf %126, %127 : vector<16x1xf32>
    %129 = vector.broadcast %128 : vector<16x1xf32> to vector<16x32xf32>
    %130 = arith.subf %122, %129 : vector<16x32xf32>
    %131 = arith.mulf %130, %130 : vector<16x32xf32>
    %cst_32 = arith.constant dense<0.000000e+00> : vector<16xf32>
    %132 = vector.multi_reduction <add>, %131, %cst_32 [1] : vector<16x32xf32> to vector<16xf32>
    %133 = vector.shape_cast %132 : vector<16xf32> to vector<16x1xf32>
    %cst_33 = arith.constant 3.200000e+01 : f32
    %134 = vector.broadcast %cst_33 : f32 to vector<16x1xf32>
    %135 = arith.divf %133, %134 : vector<16x1xf32>
    %136 = vector.broadcast %128 : vector<16x1xf32> to vector<16x32xf32>
    %137 = arith.subf %122, %136 : vector<16x32xf32>
    %cst_34 = arith.constant 9.99999996E-13 : f32
    %138 = vector.broadcast %cst_34 : f32 to vector<16x1xf32>
    %139 = arith.addf %135, %138 : vector<16x1xf32>
    %140 = math.rsqrt %139 : vector<16x1xf32>
    %141 = vector.broadcast %140 : vector<16x1xf32> to vector<16x32xf32>
    %142 = arith.mulf %137, %141 : vector<16x32xf32>
    %143 = vector.broadcast %123 : vector<1x32xf32> to vector<16x32xf32>
    %144 = arith.mulf %142, %143 : vector<16x32xf32>
    %145 = vector.broadcast %124 : vector<1x32xf32> to vector<16x32xf32>
    %146 = arith.addf %144, %145 : vector<16x32xf32>
    %c1 = arith.constant 1 : index
    %c0_35 = arith.constant 0 : index
    %c0_36 = arith.constant 0 : index
    %147 = vector.load %arg2[%c1, %c0_35, %c0_36] : memref<3x32x256xbf16, #tpu.memory_space<vmem>>, vector<1x32x256xbf16>
    %148 = vector.shape_cast %147 : vector<1x32x256xbf16> to vector<32x256xbf16>
    %149 = arith.truncf %146 : vector<16x32xf32> to vector<16x32xbf16>
    %150 = vector.extract_strided_slice %148 {offsets = [0, 0], sizes = [32, 96], strides = [1, 1]} : vector<32x256xbf16> to vector<32x96xbf16>
    %cst_37 = arith.constant dense<0.000000e+00> : vector<16x96xf32>
    %151 = tpu.matmul %149, %150, %cst_37 {dimension_numbers = #tpu.dot_dimension_numbers<[1], [0], [0], [1], [0, 0, 1, 1], [], []>} : vector<16x32xbf16>, vector<32x96xbf16>, vector<16x96xf32> -> vector<16x96xf32>
    %152 = vector.extract_strided_slice %0 {offsets = [10, 0], sizes = [1, 96], strides = [1, 1]} : vector<24x128xf32> to vector<1x96xf32>
    %153 = vector.broadcast %152 : vector<1x96xf32> to vector<16x96xf32>
    %154 = arith.addf %151, %153 : vector<16x96xf32>
    %155 = vector.extract_strided_slice %154 {offsets = [0, 0], sizes = [16, 16], strides = [1, 1]} : vector<16x96xf32> to vector<16x16xf32>
    %156 = vector.extract_strided_slice %154 {offsets = [0, 16], sizes = [16, 16], strides = [1, 1]} : vector<16x96xf32> to vector<16x16xf32>
    %157 = tpu.concatenate %155, %156 in 0 : vector<16x16xf32>, vector<16x16xf32> -> vector<32x16xf32>
    %158 = vector.extract_strided_slice %154 {offsets = [0, 32], sizes = [16, 16], strides = [1, 1]} : vector<16x96xf32> to vector<16x16xf32>
    %159 = vector.extract_strided_slice %154 {offsets = [0, 48], sizes = [16, 16], strides = [1, 1]} : vector<16x96xf32> to vector<16x16xf32>
    %160 = tpu.concatenate %158, %159 in 0 : vector<16x16xf32>, vector<16x16xf32> -> vector<32x16xf32>
    %161 = vector.extract_strided_slice %154 {offsets = [0, 64], sizes = [16, 16], strides = [1, 1]} : vector<16x96xf32> to vector<16x16xf32>
    %162 = vector.extract_strided_slice %154 {offsets = [0, 80], sizes = [16, 16], strides = [1, 1]} : vector<16x96xf32> to vector<16x16xf32>
    %163 = tpu.concatenate %161, %162 in 0 : vector<16x16xf32>, vector<16x16xf32> -> vector<32x16xf32>
    %164 = arith.truncf %157 : vector<32x16xf32> to vector<32x16xbf16>
    %165 = arith.truncf %160 : vector<32x16xf32> to vector<32x16xbf16>
    %cst_38 = arith.constant dense<0.000000e+00> : vector<32x32xf32>
    %166 = tpu.matmul %164, %165, %cst_38 {dimension_numbers = #tpu.dot_dimension_numbers<[1], [1], [0], [0], [0, 0, 1, 0], [], []>} : vector<32x16xbf16>, vector<32x16xbf16>, vector<32x32xf32> -> vector<32x32xf32>
    %cst_39 = arith.constant 2.500000e-01 : f32
    %167 = vector.broadcast %cst_39 : f32 to vector<32x32xf32>
    %168 = arith.mulf %166, %167 : vector<32x32xf32>
    %c0_40 = arith.constant 0 : index
    %c0_41 = arith.constant 0 : index
    %169 = vector.load %arg1[%c0_40, %c0_41] : memref<32x32xf32, #tpu.memory_space<vmem>>, vector<32x32xf32>
    %170 = arith.addf %168, %169 : vector<32x32xf32>
    %cst_42 = arith.constant dense<0xFF800000> : vector<32xf32>
    %171 = vector.multi_reduction <maximumf>, %170, %cst_42 [1] : vector<32x32xf32> to vector<32xf32>
    %172 = vector.shape_cast %171 : vector<32xf32> to vector<32x1xf32>
    %173 = vector.broadcast %172 : vector<32x1xf32> to vector<32x32xf32>
    %174 = arith.subf %170, %173 : vector<32x32xf32>
    %175 = math.exp %174 : vector<32x32xf32>
    %cst_43 = arith.constant dense<0.000000e+00> : vector<32xf32>
    %176 = vector.multi_reduction <add>, %175, %cst_43 [1] : vector<32x32xf32> to vector<32xf32>
    %177 = vector.shape_cast %176 : vector<32xf32> to vector<32x1xf32>
    %178 = tpu.reciprocal %177 {approx = true} : vector<32x1xf32> -> vector<32x1xf32>
    %179 = vector.broadcast %178 : vector<32x1xf32> to vector<32x32xf32>
    %180 = arith.mulf %175, %179 : vector<32x32xf32>
    %181 = arith.truncf %180 : vector<32x32xf32> to vector<32x32xbf16>
    %182 = arith.truncf %163 : vector<32x16xf32> to vector<32x16xbf16>
    %cst_44 = arith.constant dense<0.000000e+00> : vector<32x16xf32>
    %183 = tpu.matmul %181, %182, %cst_44 {dimension_numbers = #tpu.dot_dimension_numbers<[1], [0], [0], [1], [0, 0, 1, 1], [], []>} : vector<32x32xbf16>, vector<32x16xbf16>, vector<32x16xf32> -> vector<32x16xf32>
    %184 = vector.extract_strided_slice %183 {offsets = [0, 0], sizes = [16, 16], strides = [1, 1]} : vector<32x16xf32> to vector<16x16xf32>
    %185 = vector.extract_strided_slice %183 {offsets = [16, 0], sizes = [16, 16], strides = [1, 1]} : vector<32x16xf32> to vector<16x16xf32>
    %186 = tpu.concatenate %184, %185 in 1 : vector<16x16xf32>, vector<16x16xf32> -> vector<16x32xf32>
    %187 = arith.truncf %186 : vector<16x32xf32> to vector<16x32xbf16>
    %188 = vector.extract_strided_slice %148 {offsets = [0, 96], sizes = [32, 32], strides = [1, 1]} : vector<32x256xbf16> to vector<32x32xbf16>
    %cst_45 = arith.constant dense<0.000000e+00> : vector<16x32xf32>
    %189 = tpu.matmul %187, %188, %cst_45 {dimension_numbers = #tpu.dot_dimension_numbers<[1], [0], [0], [1], [0, 0, 1, 1], [], []>} : vector<16x32xbf16>, vector<32x32xbf16>, vector<16x32xf32> -> vector<16x32xf32>
    %190 = vector.extract_strided_slice %0 {offsets = [11, 0], sizes = [1, 32], strides = [1, 1]} : vector<24x128xf32> to vector<1x32xf32>
    %191 = vector.broadcast %190 : vector<1x32xf32> to vector<16x32xf32>
    %192 = arith.addf %189, %191 : vector<16x32xf32>
    %193 = arith.addf %192, %146 : vector<16x32xf32>
    %194 = vector.extract_strided_slice %0 {offsets = [12, 0], sizes = [1, 32], strides = [1, 1]} : vector<24x128xf32> to vector<1x32xf32>
    %195 = vector.extract_strided_slice %0 {offsets = [13, 0], sizes = [1, 32], strides = [1, 1]} : vector<24x128xf32> to vector<1x32xf32>
    %cst_46 = arith.constant dense<0.000000e+00> : vector<16xf32>
    %196 = vector.multi_reduction <add>, %193, %cst_46 [1] : vector<16x32xf32> to vector<16xf32>
    %197 = vector.shape_cast %196 : vector<16xf32> to vector<16x1xf32>
    %cst_47 = arith.constant 3.200000e+01 : f32
    %198 = vector.broadcast %cst_47 : f32 to vector<16x1xf32>
    %199 = arith.divf %197, %198 : vector<16x1xf32>
    %200 = vector.broadcast %199 : vector<16x1xf32> to vector<16x32xf32>
    %201 = arith.subf %193, %200 : vector<16x32xf32>
    %202 = arith.mulf %201, %201 : vector<16x32xf32>
    %cst_48 = arith.constant dense<0.000000e+00> : vector<16xf32>
    %203 = vector.multi_reduction <add>, %202, %cst_48 [1] : vector<16x32xf32> to vector<16xf32>
    %204 = vector.shape_cast %203 : vector<16xf32> to vector<16x1xf32>
    %cst_49 = arith.constant 3.200000e+01 : f32
    %205 = vector.broadcast %cst_49 : f32 to vector<16x1xf32>
    %206 = arith.divf %204, %205 : vector<16x1xf32>
    %207 = vector.broadcast %199 : vector<16x1xf32> to vector<16x32xf32>
    %208 = arith.subf %193, %207 : vector<16x32xf32>
    %cst_50 = arith.constant 9.99999996E-13 : f32
    %209 = vector.broadcast %cst_50 : f32 to vector<16x1xf32>
    %210 = arith.addf %206, %209 : vector<16x1xf32>
    %211 = math.rsqrt %210 : vector<16x1xf32>
    %212 = vector.broadcast %211 : vector<16x1xf32> to vector<16x32xf32>
    %213 = arith.mulf %208, %212 : vector<16x32xf32>
    %214 = vector.broadcast %194 : vector<1x32xf32> to vector<16x32xf32>
    %215 = arith.mulf %213, %214 : vector<16x32xf32>
    %216 = vector.broadcast %195 : vector<1x32xf32> to vector<16x32xf32>
    %217 = arith.addf %215, %216 : vector<16x32xf32>
    %218 = arith.truncf %217 : vector<16x32xf32> to vector<16x32xbf16>
    %219 = vector.extract_strided_slice %148 {offsets = [0, 128], sizes = [32, 64], strides = [1, 1]} : vector<32x256xbf16> to vector<32x64xbf16>
    %cst_51 = arith.constant dense<0.000000e+00> : vector<16x64xf32>
    %220 = tpu.matmul %218, %219, %cst_51 {dimension_numbers = #tpu.dot_dimension_numbers<[1], [0], [0], [1], [0, 0, 1, 1], [], []>} : vector<16x32xbf16>, vector<32x64xbf16>, vector<16x64xf32> -> vector<16x64xf32>
    %221 = vector.extract_strided_slice %0 {offsets = [14, 0], sizes = [1, 64], strides = [1, 1]} : vector<24x128xf32> to vector<1x64xf32>
    %222 = vector.broadcast %221 : vector<1x64xf32> to vector<16x64xf32>
    %223 = arith.addf %220, %222 : vector<16x64xf32>
    %224 = arith.mulf %223, %223 : vector<16x64xf32>
    %225 = arith.mulf %223, %224 : vector<16x64xf32>
    %cst_52 = arith.constant 4.471500e-02 : f32
    %226 = vector.broadcast %cst_52 : f32 to vector<16x64xf32>
    %227 = arith.mulf %226, %225 : vector<16x64xf32>
    %228 = arith.addf %223, %227 : vector<16x64xf32>
    %cst_53 = arith.constant 0.797884583 : f32
    %229 = vector.broadcast %cst_53 : f32 to vector<16x64xf32>
    %230 = arith.mulf %229, %228 : vector<16x64xf32>
    %231 = math.tanh %230 : vector<16x64xf32>
    %cst_54 = arith.constant 1.000000e+00 : f32
    %232 = vector.broadcast %cst_54 : f32 to vector<16x64xf32>
    %233 = arith.addf %232, %231 : vector<16x64xf32>
    %cst_55 = arith.constant 5.000000e-01 : f32
    %234 = vector.broadcast %cst_55 : f32 to vector<16x64xf32>
    %235 = arith.mulf %234, %233 : vector<16x64xf32>
    %236 = arith.mulf %223, %235 : vector<16x64xf32>
    %237 = arith.truncf %236 : vector<16x64xf32> to vector<16x64xbf16>
    %238 = vector.extract_strided_slice %148 {offsets = [0, 192], sizes = [32, 64], strides = [1, 1]} : vector<32x256xbf16> to vector<32x64xbf16>
    %cst_56 = arith.constant dense<0.000000e+00> : vector<16x32xf32>
    %239 = tpu.matmul %237, %238, %cst_56 {dimension_numbers = #tpu.dot_dimension_numbers<[1], [1], [0], [0], [0, 0, 1, 0], [], []>} : vector<16x64xbf16>, vector<32x64xbf16>, vector<16x32xf32> -> vector<16x32xf32>
    %240 = vector.extract_strided_slice %0 {offsets = [15, 0], sizes = [1, 32], strides = [1, 1]} : vector<24x128xf32> to vector<1x32xf32>
    %241 = vector.broadcast %240 : vector<1x32xf32> to vector<16x32xf32>
    %242 = arith.addf %239, %241 : vector<16x32xf32>
    %243 = arith.addf %242, %217 : vector<16x32xf32>
    %244 = vector.extract_strided_slice %0 {offsets = [16, 0], sizes = [1, 32], strides = [1, 1]} : vector<24x128xf32> to vector<1x32xf32>
    %245 = vector.extract_strided_slice %0 {offsets = [17, 0], sizes = [1, 32], strides = [1, 1]} : vector<24x128xf32> to vector<1x32xf32>
    %cst_57 = arith.constant dense<0.000000e+00> : vector<16xf32>
    %246 = vector.multi_reduction <add>, %243, %cst_57 [1] : vector<16x32xf32> to vector<16xf32>
    %247 = vector.shape_cast %246 : vector<16xf32> to vector<16x1xf32>
    %cst_58 = arith.constant 3.200000e+01 : f32
    %248 = vector.broadcast %cst_58 : f32 to vector<16x1xf32>
    %249 = arith.divf %247, %248 : vector<16x1xf32>
    %250 = vector.broadcast %249 : vector<16x1xf32> to vector<16x32xf32>
    %251 = arith.subf %243, %250 : vector<16x32xf32>
    %252 = arith.mulf %251, %251 : vector<16x32xf32>
    %cst_59 = arith.constant dense<0.000000e+00> : vector<16xf32>
    %253 = vector.multi_reduction <add>, %252, %cst_59 [1] : vector<16x32xf32> to vector<16xf32>
    %254 = vector.shape_cast %253 : vector<16xf32> to vector<16x1xf32>
    %cst_60 = arith.constant 3.200000e+01 : f32
    %255 = vector.broadcast %cst_60 : f32 to vector<16x1xf32>
    %256 = arith.divf %254, %255 : vector<16x1xf32>
    %257 = vector.broadcast %249 : vector<16x1xf32> to vector<16x32xf32>
    %258 = arith.subf %243, %257 : vector<16x32xf32>
    %cst_61 = arith.constant 9.99999996E-13 : f32
    %259 = vector.broadcast %cst_61 : f32 to vector<16x1xf32>
    %260 = arith.addf %256, %259 : vector<16x1xf32>
    %261 = math.rsqrt %260 : vector<16x1xf32>
    %262 = vector.broadcast %261 : vector<16x1xf32> to vector<16x32xf32>
    %263 = arith.mulf %258, %262 : vector<16x32xf32>
    %264 = vector.broadcast %244 : vector<1x32xf32> to vector<16x32xf32>
    %265 = arith.mulf %263, %264 : vector<16x32xf32>
    %266 = vector.broadcast %245 : vector<1x32xf32> to vector<16x32xf32>
    %267 = arith.addf %265, %266 : vector<16x32xf32>
    %c2 = arith.constant 2 : index
    %c0_62 = arith.constant 0 : index
    %c0_63 = arith.constant 0 : index
    %268 = vector.load %arg2[%c2, %c0_62, %c0_63] : memref<3x32x256xbf16, #tpu.memory_space<vmem>>, vector<1x32x256xbf16>
    %269 = vector.shape_cast %268 : vector<1x32x256xbf16> to vector<32x256xbf16>
    %270 = vector.extract_strided_slice %267 {offsets = [0, 0], sizes = [1, 32], strides = [1, 1]} : vector<16x32xf32> to vector<1x32xf32>
    %271 = vector.extract_strided_slice %267 {offsets = [8, 0], sizes = [1, 32], strides = [1, 1]} : vector<16x32xf32> to vector<1x32xf32>
    %272 = tpu.concatenate %270, %271 in 0 : vector<1x32xf32>, vector<1x32xf32> -> vector<2x32xf32>
    %273 = arith.truncf %272 : vector<2x32xf32> to vector<2x32xbf16>
    %274 = vector.extract_strided_slice %269 {offsets = [0, 128], sizes = [32, 32], strides = [1, 1]} : vector<32x256xbf16> to vector<32x32xbf16>
    %cst_64 = arith.constant dense<0.000000e+00> : vector<2x32xf32>
    %275 = tpu.matmul %273, %274, %cst_64 {dimension_numbers = #tpu.dot_dimension_numbers<[1], [0], [0], [1], [0, 0, 1, 1], [], []>} : vector<2x32xbf16>, vector<32x32xbf16>, vector<2x32xf32> -> vector<2x32xf32>
    %276 = vector.extract_strided_slice %0 {offsets = [18, 0], sizes = [1, 32], strides = [1, 1]} : vector<24x128xf32> to vector<1x32xf32>
    %277 = vector.broadcast %276 : vector<1x32xf32> to vector<2x32xf32>
    %278 = arith.addf %275, %277 : vector<2x32xf32>
    %279 = math.tanh %278 : vector<2x32xf32>
    %280 = arith.truncf %279 : vector<2x32xf32> to vector<2x32xbf16>
    %281 = vector.extract_strided_slice %269 {offsets = [0, 0], sizes = [32, 128], strides = [1, 1]} : vector<32x256xbf16> to vector<32x128xbf16>
    %cst_65 = arith.constant dense<0.000000e+00> : vector<2x128xf32>
    %282 = tpu.matmul %280, %281, %cst_65 {dimension_numbers = #tpu.dot_dimension_numbers<[1], [0], [0], [1], [0, 0, 1, 1], [], []>} : vector<2x32xbf16>, vector<32x128xbf16>, vector<2x128xf32> -> vector<2x128xf32>
    %283 = vector.extract_strided_slice %0 {offsets = [19, 0], sizes = [1, 128], strides = [1, 1]} : vector<24x128xf32> to vector<1x128xf32>
    %284 = vector.broadcast %283 : vector<1x128xf32> to vector<2x128xf32>
    %285 = arith.addf %282, %284 : vector<2x128xf32>
    %c0_66 = arith.constant 0 : index
    %c0_67 = arith.constant 0 : index
    %286 = vector.load %arg4[%c0_66, %c0_67] : memref<2x128xf32, #tpu.memory_space<vmem>>, vector<2x128xf32>
    tpu.vector_store %arg4[%c0_66, %c0_67], %285 {strides = array<i32>} : memref<2x128xf32, #tpu.memory_space<vmem>>, vector<2x128xf32>,
    return
  }
}

</mosaic_0001>

<bundles_post_ra>
// kernel: bert_forward.1
= control target key start
LH: loop header
LB: loop body
LE: loop exit
PB: predicated region body
PF: predicated region fallthrough
CT: control target
= control target key end

     0   :  { %vm23_vm0 = vcmask 261120   ;;  %v1581_v15 = vmov 0.0   ;;  %vm1582_vm1 = vmmov 0   ;;  %v51_v21 = vlaneseq  ;;  %s1583_s24 = smov 112   ;;  %s1584_s25 = smov 96   ;;  %s1946_s0 = inlined_call_operand.vmem [shape: f32[16,32], index: 0, kind: input, shape index: {}]   ;;  %s1947_s2 = inlined_call_operand.vmem [shape: bf16[3,32,256], index: 2, kind: input, shape index: {}]   ;;  %s1948_s3 = inlined_call_operand.vmem [shape: f32[24,128], index: 3, kind: input, shape index: {}]   ;;  %s1949_s1 = inlined_call_operand.vmem [shape: f32[32,32], index: 1, kind: input, shape index: {}]   ;;  %s1950_s4 = inlined_call_operand.vmem [shape: f32[2,128], index: 4, kind: output, shape index: {}]  }
   0x1   :  { %v21_v0 = vld [vmem:[%s1946_s0] sm:$0xff]  ;;  %v22_v1 = vld [vmem:[%s1946_s0 + $0x8] sm:$0xff]  ;;  %1358 = vmatprep.subr.bf16.mxu0 %v1581_v15  ;;  %v1633_v16 = vld [vmem:[%s1947_s2 + $0x10] ss:$8 sps:$4 sm:$0xff]   ;;  %1362 = vmatprep.mubr.msk.bf16.mxu0 %vm1582_vm1, %v1581_v15  ;;  %vm144_vm2 = vcmask 130048   ;;  %s1586_s12 = smov 32  }
   0x2   :  { %v24_v2 = vsel %vm23_vm0, %v21_v0, 0.0  ;;  %v27_v3 = vsel %vm23_vm0, %v22_v1, 0.0  ;;  %v1626_v14 = vld [vmem:[%s1947_s2] ss:$8 sps:$4 sm:$0xff]   ;;  %v1639_v24 = vshrl.u32 %v51_v21, 7  ;;  %v1705_v60 = vld [vmem:[%s1949_s1 + $0x10] sm:$0xff] }
   0x3   :  { %25 = vadd.xlane.f32.xlu0 %v24_v2  ;;  %1359 = vmatpush3.bf16.msra.mxu0 %v1626_v14  ;;  %v1647_v26 = vld [vmem:[%s1948_s3] sm:$0xff]  ;;  %v1694_v58 = vld [vmem:[%s1947_s2 + $0x14] ss:$8 sps:$4 sm:$0xff]   ;;  %s1587_s13 = smov 16   ;;  %vm514_vm3 = vcmask 523264   ;;  %vm1150_vm4 = vcmask 1040384  }
   0x4   :  { %1360 = vmatprep.subr.bf16.mxu0 %v1581_v15  ;;  %v1642_v25 = vsub.s32 0, %v1639_v24  ;;  %v1652_v30 = vsub.s32 1, %v1639_v24  ;;  %v1664_v39 = vsub.s32 2, %v1639_v24  ;;  %v1687_v57 = vld [vmem:[%s1947_s2 + $0x4] ss:$8 sps:$4 sm:$0xff]  }
   0x5   :  { %v1710_v63 = vld [vmem:[%s1949_s1] sm:$0xff] }
   0x6   :  { %v54_v29 = vrot.slane %v1647_v26, %v1642_v25  ;;  %v60_v34 = vrot.slane %v1647_v26, %v1652_v30  ;;  %v71_v40 = vrot.slane %v1647_v26, %v1664_v39 }
   0x7   :  { %28 = vadd.xlane.f32.xlu0 %v27_v3  ;;  %1361 = vmatpush3.bf16.msra.mxu0 %v1633_v16 }
  0x90   :  { %v26_v4 = vpop.xlane.xlu0 %25 }
  0x91   :  { %v31_v5 = vmul.f32 0.03125, %v26_v4  ;;  %v1716_v4 = vld [vmem:[%s1949_s1 + $0x8] sm:$0xff] }
  0x93   :  { %v33_v6 = vsub.f32 %v21_v0, %v31_v5 }
  0x94   :  { %v29_v7 = vpop.xlane.xlu0 %28 }
  0x95   :  { %v32_v8 = vmul.f32 0.03125, %v29_v7  ;;  %v35_v9 = vmul.f32 %v33_v6, %v33_v6 }
  0x97   :  { %v34_v10 = vsub.f32 %v22_v1, %v32_v8  ;;  %v37_v11 = vsel %vm23_vm0, %v35_v9, 0.0 }
  0x98   :  { %38 = vadd.xlane.f32.xlu1 %v37_v11  ;;  %v1725_v11 = vld [vmem:[%s1949_s1 + $0x18] sm:$0xff]  ;;  %s1585_s1 = smov 64  }
  0x99   :  { %v36_v12 = vmul.f32 %v34_v10, %v34_v10 }
  0x9b   :  { %v40_v13 = vsel %vm23_vm0, %v36_v12, 0.0 }
  0x9c   :  { %41 = vadd.xlane.f32.xlu1 %v40_v13 }
 0x125   :  { %v39_v17 = vpop.xlane.xlu1 %38 }
 0x126   :  { %v43_v18 = vmul.f32 0.03125, %v39_v17 }
 0x128   :  { %v45_v19 = vadd.f32 1e-12, %v43_v18 }
 0x129   :  { %v42_v20 = vpop.xlane.xlu1 %41 }
 0x12a   :  { %1519 = vrsqrt.f32 %v45_v19  ;;  %v44_v22 = vmul.f32 0.03125, %v42_v20 }
 0x12c   :  { %v46_v23 = vadd.f32 1e-12, %v44_v22 }
 0x12e   :  { %1521 = vrsqrt.f32 %v46_v23 }
 0x134   :  { %v1520_v27 = vpop.eup %1519 }
 0x135   :  { %v49_v28 = vmul.f32 %v1520_v27, %v33_v6 }
 0x137   :  { %v55_v33 = vmul.f32 %v54_v29, %v49_v28 }
 0x138   :  { %v1522_v31 = vpop.eup %1521 }
 0x139   :  { %v50_v32 = vmul.f32 %v1522_v31, %v34_v10  ;;  %v1656_v36 = vadd.f32 %v60_v34, %v55_v33 }
 0x13b   :  { %v56_v35 = vmul.f32 %v54_v29, %v50_v32 }
 0x13d   :  { %v1658_v37 = vadd.f32 %v60_v34, %v56_v35 }
 0x13f   :  { %v67_v38 = vpack.c.bf16 %v1658_v37, %v1656_v36 }
 0x141   :  { %1363 = vmatmul.mubr.msk.bf16.vlgmr.msra.gmra.mrb[0].mxu0 %vm23_vm0, %v67_v38 }
 0x214   :  { %v121_v41 = vpop.f32.mrb[0].mxu0 }
 0x215   :  { %v1364_v42 = vpop.f32.mrb[1].mxu0  ;;  %v122_v44 = vadd.f32 %v121_v41, %v71_v40 }
 0x216   :  { %v124_v43 = vpop.f32.mrb[2].mxu0 }
 0x217   :  { %v125_v45 = vadd.f32 %v124_v43, %v71_v40  ;;  %v1365_v46 = vpop.f32.mrb[3].mxu0 }
 0x219   :  { %v1481_v47 = vpack.i.bf16 %v125_v45, %v122_v44  ;;  %v1668_v48 = vpack.c.bf16 %v125_v45, %v122_v44 }
 0x21b   :  { %1482 = vrot.lane.b32.xlu0 %v1481_v47, %s1583_s24  ;;  %140 = vrot.lane.b32.xlu1 %v1668_v48, %s1584_s25 }
 0x21c   :  { %1370 = vmatprep.mubr.msk.bf16.mxu1 %vm144_vm2, %v1668_v48 }
 0x28d   :  { %v1483_v49 = vpop.permute.xlu0 %1482  ;;  %v141_v50 = vpop.permute.xlu1 %140 }
 0x28e   :  { %v1485_v51 = vunpack.i.h.bf16 %v1483_v49  ;;  %v1484_v52 = vunpack.i.l.bf16 %v1483_v49  ;;  %1470 = vmatprep.subr.msk.bf16.mxu1 %vm144_vm2, %v141_v50  ;;  %v152_v53 = vsel %vm144_vm2, %v141_v50, 0 }
 0x28f   :  { %1367 = vmatpush3.bf16.xpose.msra.mxu1 %v152_v53 }
 0x290   :  { %v1677_v54 = vpack.c.bf16 %v1485_v51, %v1484_v52 }
 0x292   :  { %142 = vrot.lane.b32.xlu1 %v1677_v54, %s1584_s25 }
 0x304   :  { %v143_v55 = vpop.permute.xlu1 %142 }
 0x305   :  { %1471 = vmatprep.subr.msk.bf16.mxu1 %vm144_vm2, %v143_v55  ;;  %v155_v56 = vsel %vm144_vm2, %v143_v55, 0 }
 0x306   :  { %1369 = vmatpush3.bf16.xpose.msra.mxu1 %v155_v56 }
 0x307   :  { %1390 = vmatprep.subr.bf16.mxu1 %v1581_v15 }
 0x30d   :  { %1371 = vmatmul.mubr.msk.bf16.vlgmr.msra.gmra.mrb[0].mxu1 %vm144_vm2, %v1677_v54 }
 0x30e   :  { %1391 = vmatpush3.bf16.msra.mxu1 %v1687_v57  ;;  %1394 = vmatprep.mubr.msk.bf16.mxu1 %vm1582_vm1, %v1581_v15 }
 0x30f   :  { %1392 = vmatprep.subr.bf16.mxu1 %v1581_v15 }
 0x312   :  { %1393 = vmatpush3.bf16.msra.mxu1 %v1694_v58 }
 0x313   :  { %1406 = vmatprep.subr.bf16.mxu1 %v1581_v15 }
 0x3e0   :  { %v1372_v59 = vpop.f32.mrb[0].mxu1 }
 0x3e1   :  { %v208_v61 = vmul.f32 0.25, %v1372_v59  ;;  %v191_v62 = vpop.f32.mrb[1].mxu1 }
 0x3e2   :  { %v206_v0 = vmul.f32 0.25, %v191_v62  ;;  %v1373_v1 = vpop.f32.mrb[2].mxu1 }
 0x3e3   :  { %v194_v2 = vpop.f32.mrb[3].mxu1  ;;  %v216_v3 = vadd.f32 %v1705_v60, %v208_v61  ;;  %v209_v7 = vmul.f32 0.25, %v1373_v1 }
 0x3e4   :  { %v207_v5 = vmul.f32 0.25, %v194_v2  ;;  %v214_v6 = vadd.f32 %v1710_v63, %v206_v0 }
 0x3e5   :  { %v224_v8 = vsel %vm23_vm0, %v216_v3, -inf  ;;  %v217_v13 = vadd.f32 %v1725_v11, %v209_v7 }
 0x3e6   :  { %225 = vmax.xlane.f32.xlu0 %v224_v8  ;;  %v218_v9 = vsel %vm23_vm0, %v214_v6, -inf  ;;  %v215_v10 = vadd.f32 %v1716_v4, %v207_v5 }
 0x3e7   :  { %219 = vmax.xlane.f32.xlu1 %v218_v9  ;;  %v227_v17 = vsel %vm23_vm0, %v217_v13, -inf }
 0x3e8   :  { %v221_v12 = vsel %vm23_vm0, %v215_v10, -inf }
 0x3ea   :  { %222 = vmax.xlane.f32.xlu0 %v221_v12 }
 0x3ee   :  { %228 = vmax.xlane.f32.xlu0 %v227_v17 }
 0x473   :  { %v226_v18 = vpop.xlane.xlu0 %225 }
 0x474   :  { %v232_v19 = vsub.f32 %v216_v3, %v226_v18  ;;  %v220_v20 = vpop.xlane.xlu1 %219  ;;  %v1756_v18 = vsub.s32 3, %v1639_v24 }
 0x475   :  { %v230_v21 = vsub.f32 %v214_v6, %v220_v20 }
 0x476   :  { %v238_v22 = vmul.f32 1.442695, %v232_v19 }
 0x477   :  { %v234_v23 = vmul.f32 1.442695, %v230_v21  ;;  %v223_v27 = vpop.xlane.xlu0 %222 }
 0x478   :  { %1523 = vpow2.f32 %v238_v22  ;;  %v231_v28 = vsub.f32 %v215_v10, %v223_v27 }
 0x479   :  { %1525 = vpow2.f32 %v234_v23 }
 0x47a   :  { %v236_v32 = vmul.f32 1.442695, %v231_v28 }
 0x47b   :  { %v229_v29 = vpop.xlane.xlu0 %228 }
 0x47c   :  { %v233_v31 = vsub.f32 %v217_v13, %v229_v29 }
 0x47e   :  { %v240_v33 = vmul.f32 1.442695, %v233_v31 }
 0x480   :  { %1527 = vpow2.f32 %v240_v33 }
 0x481   :  { %1529 = vpow2.f32 %v236_v32 }
 0x482   :  { %v1524_v34 = vpop.eup %1523 }
 0x483   :  { %v248_v35 = vsel %vm23_vm0, %v1524_v34, 0.0  ;;  %v1526_v38 = vpop.eup %1525 }
 0x484   :  { %249 = vadd.xlane.f32.xlu1 %v248_v35  ;;  %v242_v40 = vsel %vm23_vm0, %v1526_v38, 0.0 }
 0x488   :  { %243 = vadd.xlane.f32.xlu1 %v242_v40 }
 0x48a   :  { %v1528_v41 = vpop.eup %1527 }
 0x48b   :  { %v251_v42 = vsel %vm23_vm0, %v1528_v41, 0.0  ;;  %v1530_v43 = vpop.eup %1529 }
 0x48c   :  { %252 = vadd.xlane.f32.xlu0 %v251_v42  ;;  %v245_v44 = vsel %vm23_vm0, %v1530_v43, 0.0 }
 0x490   :  { %246 = vadd.xlane.f32.xlu0 %v245_v44 }
 0x499   :  { %264 = vrot.lane.b32.xlu1 %v1668_v48, %s1585_s1 }
 0x49d   :  { %340 = vrot.lane.b32.xlu1 %v1626_v14, %s1586_s12 }
 0x4a6   :  { %266 = vrot.lane.b32.xlu0 %v1677_v54, %s1585_s1 }
 0x511   :  { %v250_v45 = vpop.xlane.xlu1 %249 }
 0x515   :  { %v244_v46 = vpop.xlane.xlu1 %243 }
 0x519   :  { %v265_v47 = vpop.permute.xlu1 %264  ;;  %v253_v49 = vpop.xlane.xlu0 %252 }
 0x51a   :  { %1374 = vmatprep.subr.bf16.mxu0 %v265_v47  ;;  %1531 = vrcp.f32 %v253_v49 }
 0x51b   :  { %1375 = vmatpush3.bf16.msra.mxu0 %v265_v47  ;;  %1533 = vrcp.f32 %v244_v46 }
 0x51c   :  { %1535 = vrcp.f32 %v250_v45 }
 0x51d   :  { %v247_v50 = vpop.xlane.xlu0 %246  ;;  %v341_v1 = vpop.permute.xlu1 %340 }
 0x51e   :  { %1537 = vrcp.f32 %v247_v50  ;;  %v420_v50 = vsub.s32 4, %v1639_v24 }
 0x521   :  { %v267_v51 = vpop.permute.xlu0 %266 }
 0x522   :  { %1376 = vmatprep.subr.bf16.mxu0 %v267_v51 }
 0x523   :  { %1377 = vmatpush3.bf16.msra.mxu0 %v267_v51 }
 0x524   :  { %1382 = vmatprep.subr.bf16.mxu0 %v1581_v15  ;;  %v1532_v48 = vpop.eup %1531 }
 0x525   :  { %v1534_v52 = vpop.eup %1533  ;;  %v261_v55 = vmul.f32 %v1532_v48, %v1528_v41  ;;  %v421_v48 = vrot.slane %v1647_v26, %v420_v50 }
 0x526   :  { %v1536_v53 = vpop.eup %1535  ;;  %v258_v56 = vmul.f32 %v1534_v52, %v1526_v38 }
 0x527   :  { %v260_v61 = vmul.f32 %v1536_v53, %v1524_v34  ;;  %v426_v53 = vsub.s32 5, %v1639_v24 }
 0x528   :  { %v1538_v54 = vpop.eup %1537 }
 0x529   :  { %v259_v59 = vmul.f32 %v1538_v54, %v1530_v43  ;;  %v263_v0 = vpack.c.bf16 %v261_v55, %v260_v61 }
 0x52b   :  { %v262_v62 = vpack.c.bf16 %v259_v59, %v258_v56  ;;  %v427_v56 = vrot.slane %v1647_v26, %v426_v53 }
 0x52d   :  { %1378 = vmatprep.mubr.msk.bf16.mxu0 %vm23_vm0, %v262_v62 }
 0x52e   :  { %1379 = vmatmul.mubr.msk.bf16.vlgmr.msra.gmra.mrb[4].mxu0 %vm23_vm0, %v263_v0 }
 0x52f   :  { %1386 = vmatprep.mubr.msk.bf16.mxu0 %vm1582_vm1, %v1581_v15  ;;  %1383 = vmatpush3.bf16.msra.mxu0 %v341_v1 }
 0x530   :  { %1384 = vmatprep.subr.bf16.mxu0 %v1581_v15 }
 0x601   :  { %v1380_v2 = vpop.f32.mrb[4].mxu0 }
 0x602   :  { %v310_v3 = vpop.f32.mrb[5].mxu0 }
 0x603   :  { %v1381_v5 = vpop.f32.mrb[6].mxu0 }
 0x604   :  { %v1486_v6 = vpack.i.bf16 %v1381_v5, %v1380_v2  ;;  %v313_v7 = vpop.f32.mrb[7].mxu0 }
 0x606   :  { %1487 = vrot.lane.b32.xlu1 %v1486_v6, %s1587_s13  ;;  %v433_v6 = vsub.s32 6, %v1639_v24 }
 0x60a   :  { %342 = vrot.lane.b32.xlu1 %v1633_v16, %s1586_s12  ;;  %v339_v16 = vrot.slane %v1647_v26, %v1756_v18 }
 0x678   :  { %v1488_v8 = vpop.permute.xlu1 %1487 }
 0x679   :  { %v1490_v9 = vunpack.i.h.bf16 %v1488_v8  ;;  %v1489_v10 = vunpack.i.l.bf16 %v1488_v8 }
 0x67b   :  { %v333_v14 = vsel %vm144_vm2, %v310_v3, %v1489_v10  ;;  %v334_v12 = vsel %vm144_vm2, %v313_v7, %v1490_v9  ;;  %v434_v7 = vrot.slane %v1647_v26, %v433_v6 }
 0x67c   :  { %v335_v13 = vpack.c.bf16 %v334_v12, %v333_v14  ;;  %v343_v17 = vpop.permute.xlu1 %342 }
 0x67d   :  { %1385 = vmatpush3.bf16.msra.mxu0 %v343_v17 }
 0x67e   :  { %1398 = vmatprep.subr.bf16.mxu0 %v1581_v15 }
 0x680   :  { %1387 = vmatmul.mubr.msk.bf16.vlgmr.msra.gmra.mrb[8].mxu0 %vm23_vm0, %v335_v13 }
 0x681   :  { %1402 = vmatprep.mubr.msk.bf16.mxu0 %vm1582_vm1, %v1581_v15 }
 0x753   :  { %v383_v19 = vpop.f32.mrb[8].mxu0 }
 0x754   :  { %v384_v20 = vadd.f32 %v383_v19, %v339_v16  ;;  %v1388_v21 = vpop.f32.mrb[9].mxu0 }
 0x755   :  { %v386_v22 = vpop.f32.mrb[10].mxu0 }
 0x756   :  { %v387_v23 = vadd.f32 %v386_v22, %v339_v16  ;;  %v1389_v27 = vpop.f32.mrb[11].mxu0  ;;  %v390_v28 = vadd.f32 %v384_v20, %v1656_v36 }
 0x758   :  { %v392_v29 = vsel %vm23_vm0, %v390_v28, 0.0  ;;  %v391_v31 = vadd.f32 %v387_v23, %v1658_v37 }
 0x759   :  { %393 = vadd.xlane.f32.xlu0 %v392_v29 }
 0x75a   :  { %v395_v32 = vsel %vm23_vm0, %v391_v31, 0.0 }
 0x75b   :  { %396 = vadd.xlane.f32.xlu1 %v395_v32 }
 0x76c   :  { %512 = vrot.lane.b32.xlu1 %v1694_v58, %s1585_s1 }
 0x7e6   :  { %v394_v33 = vpop.xlane.xlu0 %393 }
 0x7e7   :  { %v398_v34 = vmul.f32 0.03125, %v394_v33 }
 0x7e8   :  { %v397_v35 = vpop.xlane.xlu1 %396 }
 0x7e9   :  { %v400_v38 = vsub.f32 %v390_v28, %v398_v34  ;;  %v399_v40 = vmul.f32 0.03125, %v397_v35 }
 0x7eb   :  { %v401_v41 = vsub.f32 %v391_v31, %v399_v40  ;;  %v402_v42 = vmul.f32 %v400_v38, %v400_v38 }
 0x7ec   :  { %v513_v3 = vpop.permute.xlu1 %512 }
 0x7ed   :  { %v404_v36 = vsel %vm23_vm0, %v402_v42, 0.0  ;;  %v403_v43 = vmul.f32 %v401_v41, %v401_v41  ;;  %v522_v5 = vsel %vm514_vm3, %v513_v3, 0  ;;  %v1806_v3 = vld [vmem:[%s1947_s2 + $0x30] ss:$8 sps:$4 sm:$0xff]  }
 0x7ee   :  { %405 = vadd.xlane.f32.xlu0 %v404_v36  ;;  %v508_v36 = vsub.s32 7, %v1639_v24 }
 0x7ef   :  { %v407_v37 = vsel %vm23_vm0, %v403_v43, 0.0 }
 0x7f0   :  { %v509_v43 = vrot.slane %v1647_v26, %v508_v36 }
 0x7f2   :  { %408 = vadd.xlane.f32.xlu0 %v407_v37 }
 0x808   :  { %510 = vrot.lane.b32.xlu0 %v1687_v57, %s1585_s1 }
 0x87b   :  { %v406_v44 = vpop.xlane.xlu0 %405 }
 0x87c   :  { %v410_v45 = vmul.f32 0.03125, %v406_v44 }
 0x87e   :  { %v412_v58 = vadd.f32 1e-12, %v410_v45 }
 0x87f   :  { %v409_v46 = vpop.xlane.xlu0 %408 }
 0x880   :  { %1539 = vrsqrt.f32 %v412_v58  ;;  %v411_v47 = vmul.f32 0.03125, %v409_v46 }
 0x882   :  { %v413_v49 = vadd.f32 1e-12, %v411_v47 }
 0x883   :  { %v511_v1 = vpop.permute.xlu0 %510 }
 0x884   :  { %1541 = vrsqrt.f32 %v413_v49  ;;  %v519_v2 = vsel %vm514_vm3, %v511_v1, 0 }
 0x885   :  { %1399 = vmatpush3.bf16.xpose.msra.mxu0 %v519_v2 }
 0x886   :  { %1400 = vmatprep.subr.bf16.mxu0 %v1581_v15 }
 0x88a   :  { %v1540_v51 = vpop.eup %1539 }
 0x88b   :  { %v416_v52 = vmul.f32 %v1540_v51, %v400_v38 }
 0x88d   :  { %v422_v57 = vmul.f32 %v421_v48, %v416_v52  ;;  %1401 = vmatpush3.bf16.xpose.msra.mxu0 %v522_v5 }
 0x88e   :  { %v1542_v54 = vpop.eup %1541 }
 0x88f   :  { %v417_v55 = vmul.f32 %v1542_v54, %v401_v41  ;;  %v428_v61 = vadd.f32 %v427_v56, %v422_v57 }
 0x891   :  { %v423_v59 = vmul.f32 %v421_v48, %v417_v55 }
 0x893   :  { %v429_v62 = vadd.f32 %v427_v56, %v423_v59 }
 0x895   :  { %v430_v0 = vpack.c.bf16 %v429_v62, %v428_v61 }
 0x897   :  { %1395 = vmatmul.mubr.msk.bf16.vlgmr.msra.gmra.mrb[4].mxu1 %vm23_vm0, %v430_v0 }
 0x898   :  { %1410 = vmatprep.mubr.msk.bf16.mxu1 %vm1582_vm1, %v1581_v15 }
 0x96a   :  { %v480_v8 = vpop.f32.mrb[4].mxu1 }
 0x96b   :  { %v481_v9 = vadd.f32 %v480_v8, %v434_v7  ;;  %v1396_v10 = vpop.f32.mrb[5].mxu1 }
 0x96c   :  { %v483_v14 = vpop.f32.mrb[6].mxu1 }
 0x96d   :  { %v487_v12 = vmul.f32 %v481_v9, %v481_v9  ;;  %v484_v13 = vadd.f32 %v483_v14, %v434_v7  ;;  %v1397_v17 = vpop.f32.mrb[7].mxu1 }
 0x96f   :  { %v489_v16 = vmul.f32 %v487_v12, %v481_v9  ;;  %v488_v19 = vmul.f32 %v484_v13, %v484_v13  ;;  %v1813_v12 = vld [vmem:[%s1948_s3 + $0x8] sm:$0xff] }
 0x971   :  { %v491_v20 = vmul.f32 0.044715, %v489_v16  ;;  %v490_v21 = vmul.f32 %v488_v19, %v484_v13 }
 0x973   :  { %v493_v22 = vadd.f32 %v491_v20, %v481_v9  ;;  %v492_v23 = vmul.f32 0.044715, %v490_v21 }
 0x975   :  { %v495_v27 = vmul.f32 0.7978846, %v493_v22  ;;  %v494_v28 = vadd.f32 %v492_v23, %v484_v13  ;;  %v602_v22 = vrot.slane %v1813_v12, %v1652_v30 }
 0x977   :  { %1543 = vtanh.f32 %v495_v27  ;;  %v496_v29 = vmul.f32 0.7978846, %v494_v28 }
 0x979   :  { %1545 = vtanh.f32 %v496_v29 }
 0x981   :  { %v1544_v31 = vpop.eup %1543 }
 0x982   :  { %v499_v32 = vadd.f32 1.0, %v1544_v31  ;;  %v614_v31 = vrot.slane %v1813_v12, %v1664_v39 }
 0x983   :  { %v1546_v33 = vpop.eup %1545 }
 0x984   :  { %v501_v34 = vmul.f32 0.5, %v499_v32  ;;  %v500_v35 = vadd.f32 1.0, %v1546_v33 }
 0x986   :  { %v502_v38 = vmul.f32 0.5, %v500_v35  ;;  %v503_v40 = vmul.f32 %v501_v34, %v481_v9 }
 0x988   :  { %v504_v41 = vmul.f32 %v502_v38, %v484_v13  ;;  %v596_v13 = vrot.slane %v1813_v12, %v1642_v25 }
 0x98a   :  { %v505_v42 = vpack.c.bf16 %v504_v41, %v503_v40 }
 0x98c   :  { %1403 = vmatmul.mubr.msk.bf16.vlgmr.msra.gmra.mrb[12].mxu0 %vm514_vm3, %v505_v42 }
 0xa5f   :  { %v558_v37 = vpop.f32.mrb[12].mxu0 }
 0xa60   :  { %v559_v44 = vadd.f32 %v558_v37, %v509_v43  ;;  %v1404_v45 = vpop.f32.mrb[13].mxu0 }
 0xa61   :  { %v561_v58 = vpop.f32.mrb[14].mxu0 }
 0xa62   :  { %v562_v46 = vadd.f32 %v561_v58, %v509_v43  ;;  %v1405_v47 = vpop.f32.mrb[15].mxu0  ;;  %v565_v49 = vadd.f32 %v559_v44, %v428_v61 }
 0xa64   :  { %v567_v51 = vsel %vm23_vm0, %v565_v49, 0.0  ;;  %v566_v48 = vadd.f32 %v562_v46, %v429_v62  ;;  %v1800_v62 = vld [vmem:[%s1947_s2 + $0x20] ss:$8 sps:$4 sm:$0xff]  }
 0xa65   :  { %568 = vadd.xlane.f32.xlu1 %v567_v51  ;;  %1407 = vmatpush3.bf16.msra.mxu1 %v1800_v62 }
 0xa66   :  { %v570_v52 = vsel %vm23_vm0, %v566_v48, 0.0  ;;  %1408 = vmatprep.subr.bf16.mxu1 %v1581_v15 }
 0xa67   :  { %571 = vadd.xlane.f32.xlu0 %v570_v52 }
 0xa69   :  { %1409 = vmatpush3.bf16.msra.mxu1 %v1806_v3 }
 0xaf2   :  { %v569_v54 = vpop.xlane.xlu1 %568 }
 0xaf3   :  { %v573_v57 = vmul.f32 0.03125, %v569_v54 }
 0xaf4   :  { %v572_v55 = vpop.xlane.xlu0 %571 }
 0xaf5   :  { %v575_v56 = vsub.f32 %v565_v49, %v573_v57  ;;  %v574_v59 = vmul.f32 0.03125, %v572_v55 }
 0xaf7   :  { %v576_v26 = vsub.f32 %v566_v48, %v574_v59  ;;  %v577_v0 = vmul.f32 %v575_v56, %v575_v56 }
 0xaf9   :  { %v579_v1 = vsel %vm23_vm0, %v577_v0, 0.0  ;;  %v578_v2 = vmul.f32 %v576_v26, %v576_v26 }
 0xafa   :  { %580 = vadd.xlane.f32.xlu0 %v579_v1 }
 0xafb   :  { %v582_v61 = vsel %vm23_vm0, %v578_v2, 0.0 }
 0xafc   :  { %583 = vadd.xlane.f32.xlu1 %v582_v61 }
 0xb87   :  { %v581_v5 = vpop.xlane.xlu0 %580 }
 0xb88   :  { %v585_v7 = vmul.f32 0.03125, %v581_v5 }
 0xb89   :  { %v584_v8 = vpop.xlane.xlu1 %583 }
 0xb8a   :  { %v587_v9 = vadd.f32 1e-12, %v585_v7  ;;  %v586_v10 = vmul.f32 0.03125, %v584_v8 }
 0xb8c   :  { %1547 = vrsqrt.f32 %v587_v9  ;;  %v588_v14 = vadd.f32 1e-12, %v586_v10 }
 0xb8e   :  { %1549 = vrsqrt.f32 %v588_v14 }
 0xb96   :  { %v1548_v17 = vpop.eup %1547 }
 0xb97   :  { %v591_v16 = vmul.f32 %v1548_v17, %v575_v56 }
 0xb98   :  { %v1550_v19 = vpop.eup %1549 }
 0xb99   :  { %v597_v20 = vmul.f32 %v596_v13, %v591_v16  ;;  %v592_v21 = vmul.f32 %v1550_v19, %v576_v26 }
 0xb9b   :  { %v598_v23 = vmul.f32 %v596_v13, %v592_v21  ;;  %v1819_v27 = vadd.f32 %v602_v22, %v597_v20 }
 0xb9d   :  { %v1821_v28 = vadd.f32 %v602_v22, %v598_v23 }
 0xb9f   :  { %v610_v29 = vpack.c.bf16 %v1821_v28, %v1819_v27 }
 0xba1   :  { %1411 = vmatmul.mubr.msk.bf16.vlgmr.msra.gmra.mrb[8].mxu1 %vm23_vm0, %v610_v29 }
 0xc74   :  { %v664_v32 = vpop.f32.mrb[8].mxu1 }
 0xc75   :  { %v1412_v33 = vpop.f32.mrb[9].mxu1  ;;  %v665_v35 = vadd.f32 %v664_v32, %v614_v31 }
 0xc76   :  { %v667_v34 = vpop.f32.mrb[10].mxu1 }
 0xc77   :  { %v668_v38 = vadd.f32 %v667_v34, %v614_v31  ;;  %v1413_v40 = vpop.f32.mrb[11].mxu1 }
 0xc79   :  { %v1491_v41 = vpack.i.bf16 %v668_v38, %v665_v35  ;;  %v1828_v42 = vpack.c.bf16 %v668_v38, %v665_v35 }
 0xc7b   :  { %1492 = vrot.lane.b32.xlu0 %v1491_v41, %s1583_s24  ;;  %683 = vrot.lane.b32.xlu1 %v1828_v42, %s1584_s25 }
 0xc7c   :  { %1418 = vmatprep.mubr.msk.bf16.mxu1 %vm144_vm2, %v1828_v42 }
 0xced   :  { %v1493_v43 = vpop.permute.xlu0 %1492  ;;  %v684_v37 = vpop.permute.xlu1 %683 }
 0xcee   :  { %v1495_v44 = vunpack.i.h.bf16 %v1493_v43  ;;  %v1494_v45 = vunpack.i.l.bf16 %v1493_v43  ;;  %v694_v58 = vsel %vm144_vm2, %v684_v37, 0  ;;  %1472 = vmatprep.subr.msk.bf16.mxu1 %vm144_vm2, %v684_v37 }
 0xcef   :  { %1415 = vmatpush3.bf16.xpose.msra.mxu1 %v694_v58 }
 0xcf0   :  { %v680_v46 = vpack.c.bf16 %v1495_v44, %v1494_v45 }
 0xcf2   :  { %685 = vrot.lane.b32.xlu1 %v680_v46, %s1584_s25 }
 0xd64   :  { %v686_v47 = vpop.permute.xlu1 %685 }
 0xd65   :  { %v697_v49 = vsel %vm144_vm2, %v686_v47, 0  ;;  %1473 = vmatprep.subr.msk.bf16.mxu1 %vm144_vm2, %v686_v47 }
 0xd66   :  { %1417 = vmatpush3.bf16.xpose.msra.mxu1 %v697_v49 }
 0xd67   :  { %1438 = vmatprep.subr.bf16.mxu1 %v1581_v15 }
 0xd6d   :  { %1419 = vmatmul.mubr.msk.bf16.vlgmr.msra.gmra.mrb[12].mxu1 %vm144_vm2, %v680_v46 }
 0xd6e   :  { %1442 = vmatprep.mubr.msk.bf16.mxu1 %vm1582_vm1, %v1581_v15 }
 0xe40   :  { %v1420_v51 = vpop.f32.mrb[12].mxu1 }
 0xe41   :  { %v750_v48 = vmul.f32 0.25, %v1420_v51  ;;  %v733_v52 = vpop.f32.mrb[13].mxu1 }
 0xe42   :  { %v748_v54 = vmul.f32 0.25, %v733_v52  ;;  %v1421_v57 = vpop.f32.mrb[14].mxu1 }
 0xe43   :  { %v736_v55 = vpop.f32.mrb[15].mxu1  ;;  %v754_v56 = vadd.f32 %v750_v48, %v1705_v60  ;;  %v751_v0 = vmul.f32 0.25, %v1421_v57 }
 0xe44   :  { %v749_v59 = vmul.f32 0.25, %v736_v55  ;;  %v752_v26 = vadd.f32 %v748_v54, %v1710_v63 }
 0xe45   :  { %v762_v1 = vsel %vm23_vm0, %v754_v56, -inf  ;;  %v755_v7 = vadd.f32 %v751_v0, %v1725_v11 }
 0xe46   :  { %763 = vmax.xlane.f32.xlu0 %v762_v1  ;;  %v756_v2 = vsel %vm23_vm0, %v752_v26, -inf  ;;  %v753_v61 = vadd.f32 %v749_v59, %v1716_v4 }
 0xe47   :  { %757 = vmax.xlane.f32.xlu1 %v756_v2  ;;  %v765_v8 = vsel %vm23_vm0, %v755_v7, -inf }
 0xe48   :  { %v759_v5 = vsel %vm23_vm0, %v753_v61, -inf }
 0xe4a   :  { %760 = vmax.xlane.f32.xlu0 %v759_v5 }
 0xe4e   :  { %766 = vmax.xlane.f32.xlu0 %v765_v8 }
 0xed3   :  { %v764_v60 = vpop.xlane.xlu0 %763 }
 0xed4   :  { %v770_v9 = vsub.f32 %v754_v56, %v764_v60  ;;  %v758_v63 = vpop.xlane.xlu1 %757 }
 0xed5   :  { %v768_v10 = vsub.f32 %v752_v26, %v758_v63 }
 0xed6   :  { %v776_v14 = vmul.f32 1.442695, %v770_v9 }
 0xed7   :  { %v772_v13 = vmul.f32 1.442695, %v768_v10  ;;  %v761_v17 = vpop.xlane.xlu0 %760 }
 0xed8   :  { %1551 = vpow2.f32 %v776_v14  ;;  %v769_v16 = vsub.f32 %v753_v61, %v761_v17 }
 0xed9   :  { %1553 = vpow2.f32 %v772_v13 }
 0xeda   :  { %v774_v20 = vmul.f32 1.442695, %v769_v16 }
 0xedb   :  { %v767_v4 = vpop.xlane.xlu0 %766 }
 0xedc   :  { %v771_v19 = vsub.f32 %v755_v7, %v767_v4 }
 0xede   :  { %v778_v21 = vmul.f32 1.442695, %v771_v19 }
 0xee0   :  { %1555 = vpow2.f32 %v778_v21 }
 0xee1   :  { %1557 = vpow2.f32 %v774_v20 }
 0xee2   :  { %v1552_v11 = vpop.eup %1551 }
 0xee3   :  { %v786_v22 = vsel %vm23_vm0, %v1552_v11, 0.0  ;;  %v1554_v23 = vpop.eup %1553 }
 0xee4   :  { %787 = vadd.xlane.f32.xlu1 %v786_v22  ;;  %v780_v29 = vsel %vm23_vm0, %v1554_v23, 0.0 }
 0xee8   :  { %781 = vadd.xlane.f32.xlu1 %v780_v29 }
 0xeea   :  { %v1556_v31 = vpop.eup %1555 }
 0xeeb   :  { %v789_v32 = vsel %vm23_vm0, %v1556_v31, 0.0  ;;  %v1558_v33 = vpop.eup %1557 }
 0xeec   :  { %790 = vadd.xlane.f32.xlu0 %v789_v32  ;;  %v783_v34 = vsel %vm23_vm0, %v1558_v33, 0.0 }
 0xef0   :  { %784 = vadd.xlane.f32.xlu0 %v783_v34 }
 0xef9   :  { %802 = vrot.lane.b32.xlu1 %v1828_v42, %s1585_s1 }
 0xefd   :  { %878 = vrot.lane.b32.xlu1 %v1800_v62, %s1586_s12 }
 0xf06   :  { %804 = vrot.lane.b32.xlu0 %v680_v46, %s1585_s1 }
 0xf71   :  { %v788_v35 = vpop.xlane.xlu1 %787 }
 0xf75   :  { %v782_v38 = vpop.xlane.xlu1 %781 }
 0xf79   :  { %v803_v40 = vpop.permute.xlu1 %802  ;;  %v791_v41 = vpop.xlane.xlu0 %790 }
 0xf7a   :  { %1422 = vmatprep.subr.bf16.mxu0 %v803_v40  ;;  %1559 = vrcp.f32 %v791_v41 }
 0xf7b   :  { %1423 = vmatpush3.bf16.msra.mxu0 %v803_v40  ;;  %1561 = vrcp.f32 %v782_v38 }
 0xf7c   :  { %1563 = vrcp.f32 %v788_v35 }
 0xf7d   :  { %v785_v43 = vpop.xlane.xlu0 %784  ;;  %v879_v52 = vpop.permute.xlu1 %878 }
 0xf7e   :  { %1565 = vrcp.f32 %v785_v43 }
 0xf81   :  { %v805_v37 = vpop.permute.xlu0 %804 }
 0xf82   :  { %1424 = vmatprep.subr.bf16.mxu0 %v805_v37 }
 0xf83   :  { %1425 = vmatpush3.bf16.msra.mxu0 %v805_v37 }
 0xf84   :  { %1430 = vmatprep.subr.bf16.mxu0 %v1581_v15  ;;  %v1560_v42 = vpop.eup %1559 }
 0xf85   :  { %v1562_v62 = vpop.eup %1561  ;;  %v799_v58 = vmul.f32 %v1560_v42, %v1556_v31  ;;  %v959_v42 = vrot.slane %v1813_v12, %v420_v50 }
 0xf86   :  { %v1564_v44 = vpop.eup %1563  ;;  %v796_v46 = vmul.f32 %v1562_v62, %v1554_v23 }
 0xf87   :  { %v798_v49 = vmul.f32 %v1564_v44, %v1552_v11 }
 0xf88   :  { %v1566_v45 = vpop.eup %1565 }
 0xf89   :  { %v797_v47 = vmul.f32 %v1566_v45, %v1558_v33  ;;  %v801_v48 = vpack.c.bf16 %v799_v58, %v798_v49  ;;  %v1512_v33 = vld [vmem:[%s1947_s2 + $0x34] ss:$8 sps:$4 sm:$0xff]  }
 0xf8b   :  { %v800_v51 = vpack.c.bf16 %v797_v47, %v796_v46  ;;  %v965_v46 = vrot.slane %v1813_v12, %v426_v53  ;;  %v972_v53 = vrot.slane %v1813_v12, %v433_v6 }
 0xf8d   :  { %1426 = vmatprep.mubr.msk.bf16.mxu0 %vm23_vm0, %v800_v51 }
 0xf8e   :  { %1427 = vmatmul.mubr.msk.bf16.vlgmr.msra.gmra.mrb[16].mxu0 %vm23_vm0, %v801_v48 }
 0xf8f   :  { %1434 = vmatprep.mubr.msk.bf16.mxu0 %vm1582_vm1, %v1581_v15  ;;  %1431 = vmatpush3.bf16.msra.mxu0 %v879_v52 }
 0xf90   :  { %1432 = vmatprep.subr.bf16.mxu0 %v1581_v15 }
0x1061   :  { %v1428_v54 = vpop.f32.mrb[16].mxu0 }
0x1062   :  { %v848_v57 = vpop.f32.mrb[17].mxu0 }
0x1063   :  { %v1429_v55 = vpop.f32.mrb[18].mxu0 }
0x1064   :  { %v1496_v56 = vpack.i.bf16 %v1429_v55, %v1428_v54  ;;  %v851_v59 = vpop.f32.mrb[19].mxu0 }
0x1066   :  { %1497 = vrot.lane.b32.xlu1 %v1496_v56, %s1587_s13 }
0x106a   :  { %880 = vrot.lane.b32.xlu1 %v1806_v3, %s1586_s12  ;;  %v877_v3 = vrot.slane %v1813_v12, %v1756_v18 }
0x10d8   :  { %v1498_v26 = vpop.permute.xlu1 %1497 }
0x10d9   :  { %v1500_v0 = vunpack.i.h.bf16 %v1498_v26  ;;  %v1499_v1 = vunpack.i.l.bf16 %v1498_v26 }
0x10db   :  { %v871_v2 = vsel %vm144_vm2, %v848_v57, %v1499_v1  ;;  %v872_v61 = vsel %vm144_vm2, %v851_v59, %v1500_v0 }
0x10dc   :  { %v873_v5 = vpack.c.bf16 %v872_v61, %v871_v2  ;;  %v881_v7 = vpop.permute.xlu1 %880 }
0x10dd   :  { %1433 = vmatpush3.bf16.msra.mxu0 %v881_v7 }
0x10de   :  { %1446 = vmatprep.subr.bf16.mxu0 %v1581_v15 }
0x10e0   :  { %1435 = vmatmul.mubr.msk.bf16.vlgmr.msra.gmra.mrb[20].mxu0 %vm23_vm0, %v873_v5 }
0x10e1   :  { %1450 = vmatprep.mubr.msk.bf16.mxu0 %vm1582_vm1, %v1581_v15 }
0x11b3   :  { %v921_v8 = vpop.f32.mrb[20].mxu0 }
0x11b4   :  { %v922_v60 = vadd.f32 %v921_v8, %v877_v3  ;;  %v1436_v9 = vpop.f32.mrb[21].mxu0 }
0x11b5   :  { %v924_v63 = vpop.f32.mrb[22].mxu0 }
0x11b6   :  { %v925_v10 = vadd.f32 %v924_v63, %v877_v3  ;;  %v1437_v14 = vpop.f32.mrb[23].mxu0  ;;  %v928_v13 = vadd.f32 %v922_v60, %v1819_v27 }
0x11b8   :  { %v930_v17 = vsel %vm23_vm0, %v928_v13, 0.0  ;;  %v929_v16 = vadd.f32 %v925_v10, %v1821_v28  ;;  %v1511_v28 = vld [vmem:[%s1947_s2 + $0x24] ss:$8 sps:$4 sm:$0xff]  }
0x11b9   :  { %931 = vadd.xlane.f32.xlu0 %v930_v17  ;;  %1439 = vmatpush3.bf16.msra.mxu1 %v1511_v28 }
0x11ba   :  { %v933_v4 = vsel %vm23_vm0, %v929_v16, 0.0  ;;  %1440 = vmatprep.subr.bf16.mxu1 %v1581_v15 }
0x11bb   :  { %934 = vadd.xlane.f32.xlu1 %v933_v4 }
0x11bd   :  { %1441 = vmatpush3.bf16.msra.mxu1 %v1512_v33 }
0x11be   :  { %1454 = vmatprep.subr.bf16.mxu1 %v1581_v15 }
0x11cc   :  { %1050 = vrot.lane.b32.xlu1 %v1512_v33, %s1585_s1 }
0x1246   :  { %v932_v19 = vpop.xlane.xlu0 %931 }
0x1247   :  { %v936_v20 = vmul.f32 0.03125, %v932_v19 }
0x1248   :  { %v935_v21 = vpop.xlane.xlu1 %934 }
0x1249   :  { %v938_v11 = vsub.f32 %v928_v13, %v936_v20  ;;  %v937_v22 = vmul.f32 0.03125, %v935_v21 }
0x124b   :  { %v939_v23 = vsub.f32 %v929_v16, %v937_v22  ;;  %v940_v29 = vmul.f32 %v938_v11, %v938_v11 }
0x124c   :  { %v1051_v54 = vpop.permute.xlu1 %1050 }
0x124d   :  { %v942_v31 = vsel %vm23_vm0, %v940_v29, 0.0  ;;  %v941_v32 = vmul.f32 %v939_v23, %v939_v23  ;;  %v1059_v57 = vsel %vm514_vm3, %v1051_v54, 0 }
0x124e   :  { %943 = vadd.xlane.f32.xlu0 %v942_v31 }
0x124f   :  { %v945_v27 = vsel %vm23_vm0, %v941_v32, 0.0 }
0x1252   :  { %946 = vadd.xlane.f32.xlu0 %v945_v27 }
0x1268   :  { %1048 = vrot.lane.b32.xlu0 %v1511_v28, %s1585_s1 }
0x12db   :  { %v944_v34 = vpop.xlane.xlu0 %943 }
0x12dc   :  { %v948_v35 = vmul.f32 0.03125, %v944_v34 }
0x12de   :  { %v950_v38 = vadd.f32 1e-12, %v948_v35 }
0x12df   :  { %v947_v40 = vpop.xlane.xlu0 %946 }
0x12e0   :  { %1567 = vrsqrt.f32 %v950_v38  ;;  %v949_v41 = vmul.f32 0.03125, %v947_v40 }
0x12e2   :  { %v951_v43 = vadd.f32 1e-12, %v949_v41 }
0x12e3   :  { %v1049_v52 = vpop.permute.xlu0 %1048 }
0x12e4   :  { %1569 = vrsqrt.f32 %v951_v43  ;;  %v1056_v50 = vsel %vm514_vm3, %v1049_v52, 0  ;;  %v20_v52 = vld [vmem:[%s1948_s3 + $0x10] sm:$0xff] }
0x12e5   :  { %1447 = vmatpush3.bf16.xpose.msra.mxu0 %v1056_v50  ;;  %v1133_v54 = vrot.slane %v20_v52, %v1642_v25  ;;  %v1517_v25 = vld [vmem:[%s1947_s2 + $0x40] ss:$8 sps:$4 sm:$0xff]  }
0x12e6   :  { %1448 = vmatprep.subr.bf16.mxu0 %v1581_v15 }
0x12ea   :  { %v1568_v37 = vpop.eup %1567 }
0x12eb   :  { %v954_v62 = vmul.f32 %v1568_v37, %v938_v11  ;;  %v1047_v11 = vrot.slane %v1813_v12, %v508_v36 }
0x12ed   :  { %v960_v45 = vmul.f32 %v959_v42, %v954_v62  ;;  %1449 = vmatpush3.bf16.xpose.msra.mxu0 %v1059_v57 }
0x12ee   :  { %v1570_v44 = vpop.eup %1569 }
0x12ef   :  { %v955_v58 = vmul.f32 %v1570_v44, %v939_v23  ;;  %v966_v49 = vadd.f32 %v965_v46, %v960_v45  ;;  %v1513_v44 = vld [vmem:[%s1947_s2 + $0x44] ss:$8 sps:$4 sm:$0xff]   ;;  %v1515_v45 = vld [vmem:[%s1947_s2 + $0x54] ss:$8 sps:$4 sm:$0xff]  }
0x12f1   :  { %v961_v47 = vmul.f32 %v959_v42, %v955_v58 }
0x12f3   :  { %v967_v51 = vadd.f32 %v965_v46, %v961_v47 }
0x12f5   :  { %v968_v48 = vpack.c.bf16 %v967_v51, %v966_v49 }
0x12f7   :  { %1443 = vmatmul.mubr.msk.bf16.vlgmr.msra.gmra.mrb[16].mxu1 %vm23_vm0, %v968_v48 }
0x12f8   :  { %1458 = vmatprep.mubr.msk.bf16.mxu1 %vm1582_vm1, %v1581_v15  ;;  %1455 = vmatpush3.bf16.msra.mxu1 %v1513_v44 }
0x12f9   :  { %1456 = vmatprep.subr.bf16.mxu1 %v1581_v15 }
0x12fc   :  { %1457 = vmatpush3.bf16.msra.mxu1 %v1515_v45 }
0x12fd   :  { %1462 = vmatprep.subr.bf16.mxu1 %v1581_v15 }
0x13ca   :  { %v1018_v55 = vpop.f32.mrb[16].mxu1 }
0x13cb   :  { %v1019_v56 = vadd.f32 %v1018_v55, %v972_v53  ;;  %v1444_v59 = vpop.f32.mrb[17].mxu1 }
0x13cc   :  { %v1021_v26 = vpop.f32.mrb[18].mxu1 }
0x13cd   :  { %v1025_v0 = vmul.f32 %v1019_v56, %v1019_v56  ;;  %v1022_v1 = vadd.f32 %v1021_v26, %v972_v53  ;;  %v1445_v2 = vpop.f32.mrb[19].mxu1 }
0x13cf   :  { %v1027_v61 = vmul.f32 %v1025_v0, %v1019_v56  ;;  %v1026_v5 = vmul.f32 %v1022_v1, %v1022_v1 }
0x13d1   :  { %v1029_v7 = vmul.f32 0.044715, %v1027_v61  ;;  %v1028_v3 = vmul.f32 %v1026_v5, %v1022_v1 }
0x13d3   :  { %v1031_v8 = vadd.f32 %v1029_v7, %v1019_v56  ;;  %v1030_v60 = vmul.f32 0.044715, %v1028_v3  ;;  %v1156_v7 = vrot.slane %v20_v52, %v1664_v39 }
0x13d5   :  { %v1033_v9 = vmul.f32 0.7978846, %v1031_v8  ;;  %v1032_v63 = vadd.f32 %v1030_v60, %v1022_v1 }
0x13d7   :  { %1571 = vtanh.f32 %v1033_v9  ;;  %v1034_v10 = vmul.f32 0.7978846, %v1032_v63 }
0x13d9   :  { %1573 = vtanh.f32 %v1034_v10 }
0x13e1   :  { %v1572_v14 = vpop.eup %1571 }
0x13e2   :  { %v1037_v6 = vadd.f32 1.0, %v1572_v14 }
0x13e3   :  { %v1574_v13 = vpop.eup %1573 }
0x13e4   :  { %v1039_v17 = vmul.f32 0.5, %v1037_v6  ;;  %v1038_v16 = vadd.f32 1.0, %v1574_v13  ;;  %v1217_v6 = vrot.slane %v20_v52, %v1756_v18 }
0x13e6   :  { %v1040_v4 = vmul.f32 0.5, %v1038_v16  ;;  %v1041_v19 = vmul.f32 %v1039_v17, %v1019_v56  ;;  %v1139_v56 = vrot.slane %v20_v52, %v1652_v30  ;;  %v1518_v30 = vld [vmem:[%s1947_s2 + $0x50] ss:$8 sps:$4 sm:$0xff]  }
0x13e8   :  { %v1042_v20 = vmul.f32 %v1040_v4, %v1022_v1 }
0x13ea   :  { %v1043_v21 = vpack.c.bf16 %v1042_v20, %v1041_v19 }
0x13ec   :  { %1451 = vmatmul.mubr.msk.bf16.vlgmr.msra.gmra.mrb[24].mxu0 %vm514_vm3, %v1043_v21 }
0x14bf   :  { %v1095_v22 = vpop.f32.mrb[24].mxu0 }
0x14c0   :  { %v1096_v23 = vadd.f32 %v1095_v22, %v1047_v11  ;;  %v1452_v29 = vpop.f32.mrb[25].mxu0 }
0x14c1   :  { %v1098_v31 = vpop.f32.mrb[26].mxu0 }
0x14c2   :  { %v1099_v32 = vadd.f32 %v1098_v31, %v1047_v11  ;;  %v1453_v27 = vpop.f32.mrb[27].mxu0  ;;  %v1102_v28 = vadd.f32 %v1096_v23, %v966_v49 }
0x14c4   :  { %v1104_v33 = vsel %vm23_vm0, %v1102_v28, 0.0  ;;  %v1103_v34 = vadd.f32 %v1099_v32, %v967_v51 }
0x14c5   :  { %1105 = vadd.xlane.f32.xlu0 %v1104_v33 }
0x14c6   :  { %v1107_v35 = vsel %vm23_vm0, %v1103_v34, 0.0 }
0x14c7   :  { %1108 = vadd.xlane.f32.xlu1 %v1107_v35 }
0x1552   :  { %v1106_v38 = vpop.xlane.xlu0 %1105 }
0x1553   :  { %v1110_v40 = vmul.f32 0.03125, %v1106_v38 }
0x1554   :  { %v1109_v41 = vpop.xlane.xlu1 %1108 }
0x1555   :  { %v1112_v24 = vsub.f32 %v1102_v28, %v1110_v40  ;;  %v1111_v43 = vmul.f32 0.03125, %v1109_v41 }
0x1557   :  { %v1113_v36 = vsub.f32 %v1103_v34, %v1111_v43  ;;  %v1114_v12 = vmul.f32 %v1112_v24, %v1112_v24 }
0x1559   :  { %v1116_v37 = vsel %vm23_vm0, %v1114_v12, 0.0  ;;  %v1115_v42 = vmul.f32 %v1113_v36, %v1113_v36 }
0x155a   :  { %1117 = vadd.xlane.f32.xlu1 %v1116_v37 }
0x155b   :  { %v1119_v62 = vsel %vm23_vm0, %v1115_v42, 0.0 }
0x155c   :  { %1120 = vadd.xlane.f32.xlu0 %v1119_v62 }
0x15e7   :  { %v1118_v58 = vpop.xlane.xlu1 %1117 }
0x15e8   :  { %v1122_v46 = vmul.f32 0.03125, %v1118_v58 }
0x15e9   :  { %v1121_v47 = vpop.xlane.xlu0 %1120 }
0x15ea   :  { %v1124_v49 = vadd.f32 1e-12, %v1122_v46  ;;  %v1123_v51 = vmul.f32 0.03125, %v1121_v47 }
0x15ec   :  { %1575 = vrsqrt.f32 %v1124_v49  ;;  %v1125_v48 = vadd.f32 1e-12, %v1123_v51 }
0x15ee   :  { %1577 = vrsqrt.f32 %v1125_v48 }
0x15f6   :  { %v1576_v50 = vpop.eup %1575 }
0x15f7   :  { %v1128_v57 = vmul.f32 %v1576_v50, %v1112_v24 }
0x15f8   :  { %v1578_v53 = vpop.eup %1577 }
0x15f9   :  { %v1129_v55 = vmul.f32 %v1578_v53, %v1113_v36  ;;  %v1134_v59 = vmul.f32 %v1133_v54, %v1128_v57 }
0x15fb   :  { %v1135_v26 = vmul.f32 %v1133_v54, %v1129_v55  ;;  %v1140_v1 = vadd.f32 %v1139_v56, %v1134_v59 }
0x15fd   :  { %v1141_v0 = vadd.f32 %v1139_v56, %v1135_v26 }
0x15ff   :  { %v1148_v2 = vrot.slane %v1141_v0, 7 }
0x1601   :  { %v1151_v61 = vsel %vm1150_vm4, %v1140_v1, %v1148_v2 }
0x1602   :  { %v1152_v5 = vpack.c.bf16 %v1151_v61, %v1151_v61 }
0x1604   :  { %1459 = vmatmul.mubr.msk.bf16.vlgmr.msra.gmra.mrb[20].mxu1 %vm23_vm0, %v1152_v5 }
0x1605   :  { %1466 = vmatprep.mubr.msk.bf16.mxu1 %vm1582_vm1, %v1581_v15  ;;  %1463 = vmatpush3.bf16.msra.mxu1 %v1517_v25 }
0x1606   :  { %1464 = vmatprep.subr.bf16.mxu1 %v1581_v15 }
0x1609   :  { %1465 = vmatpush3.bf16.msra.mxu1 %v1518_v30 }
0x16d7   :  { %v1206_v3 = vpop.f32.mrb[20].mxu1 }
0x16d8   :  { %v1207_v8 = vadd.f32 %v1206_v3, %v1156_v7  ;;  %v1460_v60 = vpop.f32.mrb[21].mxu1 }
0x16d9   :  { %v1209_v9 = vpop.f32.mrb[22].mxu1 }
0x16da   :  { %1579 = vtanh.f32 %v1207_v8  ;;  %v1461_v63 = vpop.f32.mrb[23].mxu1 }
0x16e4   :  { %v1580_v10 = vpop.eup %1579 }
0x16e5   :  { %v1213_v14 = vpack.c.bf16 %v1580_v10, %v1580_v10 }
0x16e7   :  { %1467 = vmatmul.mubr.msk.bf16.vlgmr.msra.gmra.mrb[24].mxu1 %vm23_vm0, %v1213_v14 }
0x17ba   :  { %v1263_v15 = vpop.f32.mrb[24].mxu1 }
0x17bb   :  { %v1264_v13 = vadd.f32 %v1263_v15, %v1217_v6  ;;  %v1468_v17 = vpop.f32.mrb[25].mxu1 }
0x17bc   :  { %v1266_v16 = vpop.f32.mrb[26].mxu1 }
0x17bd   :  { %1269 = vst [vmem:[%s1950_s4] sm:$0x3] %v1264_v13  ;;  %v1469_v39 = vpop.f32.mrb[27].mxu1 }

</bundles_post_ra>
